<compile_context>
chip_gen: v6e
topology: v6e:2x2x1
jax: 0.10.0
libtpu: 0.0.40
codegen_flags: <defaults>
</compile_context>

<pallas_src>
import math
import jax
import jax.numpy as jnp
from jax.experimental import pallas as pl
from jax.experimental.pallas import tpu as pltpu

# ---------------- mini-BERT config (synthetic, small) ----------------
VOCAB = 50
TYPE_VOCAB = 2
MAX_POS = 16
HIDDEN = 32          # embedding_dim
NUM_HEADS = 4
HEAD_DIM = HIDDEN // NUM_HEADS
INTER = 64
NUM_LAYERS = 2
CODE_LENGTH = 16     # code_length
LN_EPS = 1e-12

# packed per-layer vector offsets (lane axis of the (L, 1, _LVEC) array)
_O_BQKV = 0
_O_BO = _O_BQKV + 3 * HIDDEN
_O_LN1G = _O_BO + HIDDEN
_O_LN1B = _O_LN1G + HIDDEN
_O_BI = _O_LN1B + HIDDEN
_O_BF = _O_BI + INTER
_O_LN2G = _O_BF + HIDDEN
_O_LN2B = _O_LN2G + HIDDEN
_LVEC = _O_LN2B + HIDDEN          # 352

# packed global vector offsets: emb_ln_g | emb_ln_b | fc_b
_O_EG = 0
_O_EB = _O_EG + HIDDEN
_O_FCB = _O_EB + HIDDEN
_GVEC = _O_FCB + CODE_LENGTH      # 80

# target row count so the flat (BB*S, H) matmuls fill MXU rows when B allows
_TARGET_ROWS = 256


# ---------------- in-kernel helpers (traced, no extra launches) ----------------
def _layernorm(x, g, b):
    mu = jnp.mean(x, axis=-1, keepdims=True)
    var = jnp.mean(jnp.square(x - mu), axis=-1, keepdims=True)
    inv = jax.lax.rsqrt(var + LN_EPS)
    return (x - mu) * inv * g + b


def _gelu(x):
    # tanh-approx GELU (BERT activation).
    # TODO(synk): HF bert-base-uncased default is exact erf GELU; tanh approx kept here.
    c = math.sqrt(2.0 / math.pi)
    return 0.5 * x * (1.0 + jnp.tanh(c * (x + 0.044715 * x * x * x)))


def _bf16(x):
    return x.astype(jnp.bfloat16)


# ---------------- single fused kernel: BB sequences per grid step ----------------
def _fused_textnet_kernel(emb_ref, bias_ref, gvec_ref,
                          wqkv_ref, wo_ref, wi_ref, wf_ref, lvec_ref, fcw_ref,
                          o_ref,
                          qkv_ref, ctx_ref):
    BB, S, _ = emb_ref.shape
    R = BB * S

    # flatten BB sequences to (R, H) rows: with S == 8 this is tile-aligned
    x = emb_ref[...].astype(jnp.float32).reshape(R, HIDDEN)

    emb_g = gvec_ref[:, _O_EG:_O_EG + HIDDEN]
    emb_b = gvec_ref[:, _O_EB:_O_EB + HIDDEN]
    fc_b = gvec_ref[:, _O_FCB:_O_FCB + CODE_LENGTH]

    # BERT embedding LayerNorm
    h = _layernorm(x, emb_g, emb_b)                                   # (R, H) f32

    # additive attention bias broadcast ONCE (hoisted out of head/layer loops)
    bias3 = jnp.broadcast_to(bias_ref[...].astype(jnp.float32), (BB, S, S))

    # NOTE: L=2 -> static unroll is fine; use lax.fori_loop + weight streaming
    # if NUM_LAYERS grows toward real bert-base.
    for l in range(NUM_LAYERS):
        bqkv = lvec_ref[l, :, _O_BQKV:_O_BQKV + 3 * HIDDEN]           # (1, 3H)
        bo = lvec_ref[l, :, _O_BO:_O_BO + HIDDEN]                     # (1, H)
        ln1g = lvec_ref[l, :, _O_LN1G:_O_LN1G + HIDDEN]
        ln1b = lvec_ref[l, :, _O_LN1B:_O_LN1B + HIDDEN]
        bi = lvec_ref[l, :, _O_BI:_O_BI + INTER]                      # (1, I)
        bf = lvec_ref[l, :, _O_BF:_O_BF + HIDDEN]
        ln2g = lvec_ref[l, :, _O_LN2G:_O_LN2G + HIDDEN]
        ln2b = lvec_ref[l, :, _O_LN2B:_O_LN2B + HIDDEN]

        # ---- fused Q|K|V projection on the flat (R, H) activation ----
        # (1/sqrt(HEAD_DIM) is pre-folded into the Q columns of wqkv/bqkv)
        qkv = jnp.dot(_bf16(h), wqkv_ref[l],
                      preferred_element_type=jnp.float32) + bqkv      # (R, 3H) f32
        qkv_ref[...] = qkv.reshape(BB, S, 3 * HIDDEN)

        # ---- multi-head attention: static REF slices per head (no vreg lane slicing),
        #      sequences batched via dot_general batch dims ----
        for hh in range(NUM_HEADS):
            q0 = hh * HEAD_DIM
            q_h = qkv_ref[:, :, q0:q0 + HEAD_DIM]                     # (BB, S, Dh)
            k_h = qkv_ref[:, :, HIDDEN + q0:HIDDEN + q0 + HEAD_DIM]
            v_h = qkv_ref[:, :, 2 * HIDDEN + q0:2 * HIDDEN + q0 + HEAD_DIM]
            s = jax.lax.dot_general(q_h, k_h, (((2,), (2,)), ((0,), (0,))),
                                    preferred_element_type=jnp.float32) + bias3
            s = s - jnp.max(s, axis=-1, keepdims=True)
            p = jnp.exp(s)
            p = p * pl.reciprocal(jnp.sum(p, axis=-1, keepdims=True), approx=True)
            ctx_ref[:, :, q0:q0 + HEAD_DIM] = jax.lax.dot_general(
                p, v_h, (((2,), (1,)), ((0,), (0,))),
                preferred_element_type=jnp.float32)                   # (BB, S, Dh)

        # single (R,H)x(H,H) output projection on the concatenated context
        attn = jnp.dot(_bf16(ctx_ref[...].reshape(R, HIDDEN)), wo_ref[l],
                       preferred_element_type=jnp.float32) + bo
        h = _layernorm(h + attn, ln1g, ln1b)                          # residual + LN

        # ---- FFN ----
        inter = _gelu(jnp.dot(_bf16(h), wi_ref[l],
                              preferred_element_type=jnp.float32) + bi)
        ffn = jnp.dot(_bf16(inter), wf_ref[l],
                      preferred_element_type=jnp.float32) + bf
        h = _layernorm(h + ffn, ln2g, ln2b)

    # ---- text_embeddings = output[0][:, 0, :] ([CLS]) ; features = fc(...) ----
    cls = h.reshape(BB, S, HIDDEN)[:, 0, :]                           # (BB, H)
    feats = jnp.dot(_bf16(cls), fcw_ref[...],
                    preferred_element_type=jnp.float32) + fc_b        # (BB, C)
    o_ref[...] = feats.astype(o_ref.dtype)


# ---------------- parameters (deterministic, synthetic) ----------------
def init_params(key):
    keys = iter(jax.random.split(key, 64))

    def nrm(shape):
        return 0.02 * jax.random.normal(next(keys), shape, dtype=jnp.float32)

    L = NUM_LAYERS
    return {
        "word_emb": nrm((VOCAB, HIDDEN)),
        "pos_emb": nrm((MAX_POS, HIDDEN)),
        "type_emb": nrm((TYPE_VOCAB, HIDDEN)),
        "emb_ln_g": jnp.ones((HIDDEN,), jnp.float32),
        "emb_ln_b": jnp.zeros((HIDDEN,), jnp.float32),
        "wqkv": nrm((L, HIDDEN, 3 * HIDDEN)),
        "bqkv": jnp.zeros((L, 3 * HIDDEN), jnp.float32),
        "wo": nrm((L, HIDDEN, HIDDEN)),
        "bo": jnp.zeros((L, HIDDEN), jnp.float32),
        "ln1_g": jnp.ones((L, HIDDEN), jnp.float32),
        "ln1_b": jnp.zeros((L, HIDDEN), jnp.float32),
        "wi": nrm((L, HIDDEN, INTER)),
        "bi": jnp.zeros((L, INTER), jnp.float32),
        "wf": nrm((L, INTER, HIDDEN)),
        "bf": jnp.zeros((L, HIDDEN), jnp.float32),
        "ln2_g": jnp.ones((L, HIDDEN), jnp.float32),
        "ln2_b": jnp.zeros((L, HIDDEN), jnp.float32),
        "fc_w": nrm((HIDDEN, CODE_LENGTH)),
        "fc_b": jnp.zeros((CODE_LENGTH,), jnp.float32),
    }


def pack_params(params):
    """One-time (offline) weight prep for the kernel:
    fold the attention scale into wqkv's Q columns, pack the tiny bias/LN vectors
    into two arrays, cast matmul weights to bf16."""
    L = NUM_LAYERS
    scale = 1.0 / math.sqrt(HEAD_DIM)
    colscale = jnp.concatenate([jnp.full((HIDDEN,), scale, jnp.float32),
                                jnp.ones((2 * HIDDEN,), jnp.float32)])
    wqkv = params["wqkv"] * colscale[None, None, :]
    bqkv = params["bqkv"] * colscale[None, :]

    lvec = jnp.concatenate(
        [bqkv, params["bo"], params["ln1_g"], params["ln1_b"],
         params["bi"], params["bf"], params["ln2_g"], params["ln2_b"]],
        axis=-1).astype(jnp.float32).reshape(L, 1, _LVEC)
    gvec = jnp.concatenate(
        [params["emb_ln_g"], params["emb_ln_b"], params["fc_b"]]
    ).astype(jnp.float32).reshape(1, _GVEC)

    return {
        "word_emb": params["word_emb"],
        "pos_emb": params["pos_emb"],
        "type_emb": params["type_emb"],
        "gvec": gvec,
        "lvec": lvec,
        "wqkv": wqkv.astype(jnp.bfloat16),
        "wo": params["wo"].astype(jnp.bfloat16),
        "wi": params["wi"].astype(jnp.bfloat16),
        "wf": params["wf"].astype(jnp.bfloat16),
        "fc_w": params["fc_w"].astype(jnp.bfloat16),
    }


# ---------------- TextNet forward ----------------
def textnet_forward(kp, tokens, segments, input_masks):
    B, S = tokens.shape
    L = NUM_LAYERS

    # --- BERT embedding gathers (table lookups stay as XLA glue) ---
    positions = jnp.arange(S, dtype=jnp.int32)
    emb = (kp["word_emb"][tokens]
           + kp["pos_emb"][positions][None, :, :]
           + kp["type_emb"][segments])                                # (B, S, H) f32

    # additive attention-mask bias, as in BERT (kept general: any 0/1 mask)
    mask_bias = ((1.0 - input_masks.astype(jnp.float32)) * -10000.0)[:, None, :]  # (B,1,S)

    # --- batch blocking: BB sequences per grid step (flattened to BB*S rows inside).
    # Tiny B -> one grid step (single-TC v5e/v6e optimum); large B -> multiple
    # "parallel" grid steps so v7x's second TensorCore gets work.
    BB = min(B, max(1, _TARGET_ROWS // S))
    NB = (B + BB - 1) // BB
    Bp = NB * BB
    if Bp != B:
        emb = jnp.pad(emb, ((0, Bp - B), (0, 0), (0, 0)))
        mask_bias = jnp.pad(mask_bias, ((0, Bp - B), (0, 0), (0, 0)))

    def wspec(shape):
        n = len(shape)
        return pl.BlockSpec(shape, lambda i, _n=n: (0,) * _n)

    out = pl.pallas_call(
        _fused_textnet_kernel,
        out_shape=jax.ShapeDtypeStruct((Bp, CODE_LENGTH), jnp.float32),
        grid=(NB,),
        in_specs=[
            pl.BlockSpec((BB, S, HIDDEN), lambda i: (i, 0, 0)),       # emb
            pl.BlockSpec((BB, 1, S), lambda i: (i, 0, 0)),            # mask bias
            wspec((1, _GVEC)),                                        # emb LN g/b | fc_b
            wspec((L, HIDDEN, 3 * HIDDEN)),                           # wqkv (bf16)
            wspec((L, HIDDEN, HIDDEN)),                               # wo   (bf16)
            wspec((L, HIDDEN, INTER)),                                # wi   (bf16)
            wspec((L, INTER, HIDDEN)),                                # wf   (bf16)
            wspec((L, 1, _LVEC)),                                     # packed per-layer vecs
            wspec((HIDDEN, CODE_LENGTH)),                             # fc_w (bf16)
        ],
        out_specs=pl.BlockSpec((BB, CODE_LENGTH), lambda i: (i, 0)),
        scratch_shapes=[
            pltpu.VMEM((BB, S, 3 * HIDDEN), jnp.float32),             # qkv scratch
            pltpu.VMEM((BB, S, HIDDEN), jnp.float32),                 # concat ctx scratch
        ],
        compiler_params=pltpu.CompilerParams(
            dimension_semantics=("parallel",)),
    )(emb, mask_bias, kp["gvec"], kp["wqkv"], kp["wo"], kp["wi"], kp["wf"],
      kp["lvec"], kp["fc_w"])
    return out[:B]                                                    # (B, code_length)


if __name__ == "__main__":
    key = jax.random.PRNGKey(0)
    pkey, tkey = jax.random.split(key)
    params = init_params(pkey)
    kparams = pack_params(params)          # one-time offline weight prep

    B, S = 2, 8
    tokens = jax.random.randint(tkey, (B, S), 0, VOCAB, dtype=jnp.int32)
    segments = jnp.zeros((B, S), jnp.int32).at[:, S // 2:].set(1)
    input_masks = jnp.ones((B, S), jnp.int32).at[1, 6:].set(0)   # pad last 2 of sample 1

    feats = jax.jit(textnet_forward)(kparams, tokens, segments, input_masks)
    feats = jax.block_until_ready(feats)
    assert feats.shape == (B, CODE_LENGTH) and feats.dtype == jnp.float32
    assert bool(jnp.all(jnp.isfinite(feats)))
    print("KERNEL_OK")
</pallas_src>

<mosaic_0001>
module attributes {stable_mosaic.version = 11 : i64} {
  func.func @_fused_textnet_kernel(%arg0: i32, %arg1: memref<2x8x32xf32, #tpu.memory_space<vmem>>, %arg2: memref<2x1x8xf32, #tpu.memory_space<vmem>>, %arg3: memref<1x80xf32, #tpu.memory_space<vmem>>, %arg4: memref<2x32x96xbf16, #tpu.memory_space<vmem>>, %arg5: memref<2x32x32xbf16, #tpu.memory_space<vmem>>, %arg6: memref<2x32x64xbf16, #tpu.memory_space<vmem>>, %arg7: memref<2x64x32xbf16, #tpu.memory_space<vmem>>, %arg8: memref<2x1x352xf32, #tpu.memory_space<vmem>>, %arg9: memref<32x16xbf16, #tpu.memory_space<vmem>>, %arg10: memref<2x16xf32, #tpu.memory_space<vmem>>, %arg11: memref<2x8x96xf32, #tpu.memory_space<vmem>>, %arg12: memref<2x8x32xf32, #tpu.memory_space<vmem>>) attributes {dimension_semantics = [#tpu.dimension_semantics<parallel>], iteration_bounds = array<i64: 1>, scalar_prefetch = 0 : i64, scratch_operands = 2 : i64, tpu.core_type = #tpu.core_type<tc>, window_params = [{transform_indices = @transform_0, window_bounds = array<i64: 2, 8, 32>}, {transform_indices = @transform_1, window_bounds = array<i64: 2, 1, 8>}, {pipeline_mode = #tpu.pipeline_mode<synchronous>, transform_indices = @transform_2, window_bounds = array<i64: 1, 80>}, {pipeline_mode = #tpu.pipeline_mode<synchronous>, transform_indices = @transform_3, window_bounds = array<i64: 2, 32, 96>}, {pipeline_mode = #tpu.pipeline_mode<synchronous>, transform_indices = @transform_4, window_bounds = array<i64: 2, 32, 32>}, {pipeline_mode = #tpu.pipeline_mode<synchronous>, transform_indices = @transform_5, window_bounds = array<i64: 2, 32, 64>}, {pipeline_mode = #tpu.pipeline_mode<synchronous>, transform_indices = @transform_6, window_bounds = array<i64: 2, 64, 32>}, {pipeline_mode = #tpu.pipeline_mode<synchronous>, transform_indices = @transform_7, window_bounds = array<i64: 2, 1, 352>}, {pipeline_mode = #tpu.pipeline_mode<synchronous>, transform_indices = @transform_8, window_bounds = array<i64: 32, 16>}, {transform_indices = @transform_9, window_bounds = array<i64: 2, 16>}]} {
    %c0 = arith.constant 0 : index
    %c0_0 = arith.constant 0 : index
    %c0_1 = arith.constant 0 : index
    %0 = vector.load %arg1[%c0, %c0_0, %c0_1] : memref<2x8x32xf32, #tpu.memory_space<vmem>>, vector<2x8x32xf32>
    %1 = vector.shape_cast %0 : vector<2x8x32xf32> to vector<16x32xf32>
    %c0_2 = arith.constant 0 : index
    %c0_3 = arith.constant 0 : index
    %2 = vector.load %arg3[%c0_2, %c0_3] : memref<1x80xf32, #tpu.memory_space<vmem>>, vector<1x32xf32>
    %c0_4 = arith.constant 0 : index
    %c32 = arith.constant 32 : index
    %3 = vector.load %arg3[%c0_4, %c32] : memref<1x80xf32, #tpu.memory_space<vmem>>, vector<1x32xf32>
    %c0_5 = arith.constant 0 : index
    %c64 = arith.constant 64 : index
    %4 = vector.load %arg3[%c0_5, %c64] : memref<1x80xf32, #tpu.memory_space<vmem>>, vector<1x16xf32>
    %cst = arith.constant dense<0.000000e+00> : vector<16xf32>
    %5 = vector.multi_reduction <add>, %1, %cst [1] : vector<16x32xf32> to vector<16xf32>
    %6 = vector.shape_cast %5 : vector<16xf32> to vector<16x1xf32>
    %cst_6 = arith.constant 3.200000e+01 : f32
    %7 = vector.broadcast %cst_6 : f32 to vector<16x1xf32>
    %8 = arith.divf %6, %7 : vector<16x1xf32>
    %9 = vector.broadcast %8 : vector<16x1xf32> to vector<16x32xf32>
    %10 = arith.subf %1, %9 : vector<16x32xf32>
    %11 = arith.mulf %10, %10 : vector<16x32xf32>
    %cst_7 = arith.constant dense<0.000000e+00> : vector<16xf32>
    %12 = vector.multi_reduction <add>, %11, %cst_7 [1] : vector<16x32xf32> to vector<16xf32>
    %13 = vector.shape_cast %12 : vector<16xf32> to vector<16x1xf32>
    %cst_8 = arith.constant 3.200000e+01 : f32
    %14 = vector.broadcast %cst_8 : f32 to vector<16x1xf32>
    %15 = arith.divf %13, %14 : vector<16x1xf32>
    %cst_9 = arith.constant 9.99999996E-13 : f32
    %16 = vector.broadcast %cst_9 : f32 to vector<16x1xf32>
    %17 = arith.addf %15, %16 : vector<16x1xf32>
    %18 = math.rsqrt %17 : vector<16x1xf32>
    %19 = vector.broadcast %8 : vector<16x1xf32> to vector<16x32xf32>
    %20 = arith.subf %1, %19 : vector<16x32xf32>
    %21 = vector.broadcast %18 : vector<16x1xf32> to vector<16x32xf32>
    %22 = arith.mulf %20, %21 : vector<16x32xf32>
    %23 = vector.broadcast %2 : vector<1x32xf32> to vector<16x32xf32>
    %24 = arith.mulf %22, %23 : vector<16x32xf32>
    %25 = vector.broadcast %3 : vector<1x32xf32> to vector<16x32xf32>
    %26 = arith.addf %24, %25 : vector<16x32xf32>
    %c0_10 = arith.constant 0 : index
    %c0_11 = arith.constant 0 : index
    %c0_12 = arith.constant 0 : index
    %27 = vector.load %arg2[%c0_10, %c0_11, %c0_12] : memref<2x1x8xf32, #tpu.memory_space<vmem>>, vector<2x1x8xf32>
    %28 = vector.shape_cast %27 : vector<2x1x8xf32> to vector<2x1x8xf32>
    %29 = vector.broadcast %28 : vector<2x1x8xf32> to vector<2x8x8xf32>
    %c0_13 = arith.constant 0 : index
    %c0_14 = arith.constant 0 : index
    %c0_15 = arith.constant 0 : index
    %30 = vector.load %arg8[%c0_13, %c0_14, %c0_15] : memref<2x1x352xf32, #tpu.memory_space<vmem>>, vector<1x1x96xf32>
    %31 = vector.shape_cast %30 : vector<1x1x96xf32> to vector<1x96xf32>
    %c0_16 = arith.constant 0 : index
    %c0_17 = arith.constant 0 : index
    %c96 = arith.constant 96 : index
    %32 = vector.load %arg8[%c0_16, %c0_17, %c96] : memref<2x1x352xf32, #tpu.memory_space<vmem>>, vector<1x1x32xf32>
    %33 = vector.shape_cast %32 : vector<1x1x32xf32> to vector<1x32xf32>
    %c0_18 = arith.constant 0 : index
    %c0_19 = arith.constant 0 : index
    %c128 = arith.constant 128 : index
    %34 = vector.load %arg8[%c0_18, %c0_19, %c128] : memref<2x1x352xf32, #tpu.memory_space<vmem>>, vector<1x1x32xf32>
    %35 = vector.shape_cast %34 : vector<1x1x32xf32> to vector<1x32xf32>
    %c0_20 = arith.constant 0 : index
    %c0_21 = arith.constant 0 : index
    %c160 = arith.constant 160 : index
    %36 = vector.load %arg8[%c0_20, %c0_21, %c160] : memref<2x1x352xf32, #tpu.memory_space<vmem>>, vector<1x1x32xf32>
    %37 = vector.shape_cast %36 : vector<1x1x32xf32> to vector<1x32xf32>
    %c0_22 = arith.constant 0 : index
    %c0_23 = arith.constant 0 : index
    %c192 = arith.constant 192 : index
    %38 = vector.load %arg8[%c0_22, %c0_23, %c192] : memref<2x1x352xf32, #tpu.memory_space<vmem>>, vector<1x1x64xf32>
    %39 = vector.shape_cast %38 : vector<1x1x64xf32> to vector<1x64xf32>
    %c0_24 = arith.constant 0 : index
    %c0_25 = arith.constant 0 : index
    %c256 = arith.constant 256 : index
    %40 = vector.load %arg8[%c0_24, %c0_25, %c256] : memref<2x1x352xf32, #tpu.memory_space<vmem>>, vector<1x1x32xf32>
    %41 = vector.shape_cast %40 : vector<1x1x32xf32> to vector<1x32xf32>
    %c0_26 = arith.constant 0 : index
    %c0_27 = arith.constant 0 : index
    %c288 = arith.constant 288 : index
    %42 = vector.load %arg8[%c0_26, %c0_27, %c288] : memref<2x1x352xf32, #tpu.memory_space<vmem>>, vector<1x1x32xf32>
    %43 = vector.shape_cast %42 : vector<1x1x32xf32> to vector<1x32xf32>
    %c0_28 = arith.constant 0 : index
    %c0_29 = arith.constant 0 : index
    %c320 = arith.constant 320 : index
    %44 = vector.load %arg8[%c0_28, %c0_29, %c320] : memref<2x1x352xf32, #tpu.memory_space<vmem>>, vector<1x1x32xf32>
    %45 = vector.shape_cast %44 : vector<1x1x32xf32> to vector<1x32xf32>
    %46 = arith.truncf %26 : vector<16x32xf32> to vector<16x32xbf16>
    %c0_30 = arith.constant 0 : index
    %c0_31 = arith.constant 0 : index
    %c0_32 = arith.constant 0 : index
    %47 = vector.load %arg4[%c0_30, %c0_31, %c0_32] : memref<2x32x96xbf16, #tpu.memory_space<vmem>>, vector<1x32x96xbf16>
    %48 = vector.shape_cast %47 : vector<1x32x96xbf16> to vector<32x96xbf16>
    %cst_33 = arith.constant dense<0.000000e+00> : vector<16x96xf32>
    %49 = tpu.matmul %46, %48, %cst_33 {dimension_numbers = #tpu.dot_dimension_numbers<[1], [0], [0], [1], [0, 0, 1, 1], [], []>} : vector<16x32xbf16>, vector<32x96xbf16>, vector<16x96xf32> -> vector<16x96xf32>
    %50 = vector.broadcast %31 : vector<1x96xf32> to vector<16x96xf32>
    %51 = arith.addf %49, %50 : vector<16x96xf32>
    %52 = vector.shape_cast %51 : vector<16x96xf32> to vector<2x8x96xf32>
    %c0_34 = arith.constant 0 : index
    %c0_35 = arith.constant 0 : index
    %c0_36 = arith.constant 0 : index
    %53 = vector.load %arg11[%c0_34, %c0_35, %c0_36] : memref<2x8x96xf32, #tpu.memory_space<vmem>>, vector<2x8x96xf32>
    tpu.vector_store %arg11[%c0_34, %c0_35, %c0_36], %52 {strides = array<i32>} : memref<2x8x96xf32, #tpu.memory_space<vmem>>, vector<2x8x96xf32>,
    %c0_37 = arith.constant 0 : index
    %c0_38 = arith.constant 0 : index
    %c0_39 = arith.constant 0 : index
    %54 = vector.load %arg11[%c0_37, %c0_38, %c0_39] : memref<2x8x96xf32, #tpu.memory_space<vmem>>, vector<2x8x8xf32>
    %c0_40 = arith.constant 0 : index
    %c0_41 = arith.constant 0 : index
    %c32_42 = arith.constant 32 : index
    %55 = vector.load %arg11[%c0_40, %c0_41, %c32_42] : memref<2x8x96xf32, #tpu.memory_space<vmem>>, vector<2x8x8xf32>
    %c0_43 = arith.constant 0 : index
    %c0_44 = arith.constant 0 : index
    %c64_45 = arith.constant 64 : index
    %56 = vector.load %arg11[%c0_43, %c0_44, %c64_45] : memref<2x8x96xf32, #tpu.memory_space<vmem>>, vector<2x8x8xf32>
    %cst_46 = arith.constant dense<0.000000e+00> : vector<2x8x8xf32>
    %57 = tpu.matmul %54, %55, %cst_46 {dimension_numbers = #tpu.dot_dimension_numbers<[2], [2], [1], [1], [0, 0, 0, 1, 1, 1], [0], [0]>} : vector<2x8x8xf32>, vector<2x8x8xf32>, vector<2x8x8xf32> -> vector<2x8x8xf32>
    %58 = arith.addf %57, %29 : vector<2x8x8xf32>
    %cst_47 = arith.constant dense<0xFF800000> : vector<2x8xf32>
    %59 = vector.multi_reduction <maximumf>, %58, %cst_47 [2] : vector<2x8x8xf32> to vector<2x8xf32>
    %60 = vector.shape_cast %59 : vector<2x8xf32> to vector<2x8x1xf32>
    %61 = vector.broadcast %60 : vector<2x8x1xf32> to vector<2x8x8xf32>
    %62 = arith.subf %58, %61 : vector<2x8x8xf32>
    %63 = math.exp %62 : vector<2x8x8xf32>
    %cst_48 = arith.constant dense<0.000000e+00> : vector<2x8xf32>
    %64 = vector.multi_reduction <add>, %63, %cst_48 [2] : vector<2x8x8xf32> to vector<2x8xf32>
    %65 = vector.shape_cast %64 : vector<2x8xf32> to vector<2x8x1xf32>
    %66 = tpu.reciprocal %65 {approx = true} : vector<2x8x1xf32> -> vector<2x8x1xf32>
    %67 = vector.broadcast %66 : vector<2x8x1xf32> to vector<2x8x8xf32>
    %68 = arith.mulf %63, %67 : vector<2x8x8xf32>
    %cst_49 = arith.constant dense<0.000000e+00> : vector<2x8x8xf32>
    %69 = tpu.matmul %68, %56, %cst_49 {dimension_numbers = #tpu.dot_dimension_numbers<[2], [1], [1], [2], [0, 0, 0, 1, 1, 2], [0], [0]>} : vector<2x8x8xf32>, vector<2x8x8xf32>, vector<2x8x8xf32> -> vector<2x8x8xf32>
    %c0_50 = arith.constant 0 : index
    %c0_51 = arith.constant 0 : index
    %c0_52 = arith.constant 0 : index
    %70 = vector.load %arg12[%c0_50, %c0_51, %c0_52] : memref<2x8x32xf32, #tpu.memory_space<vmem>>, vector<2x8x8xf32>
    tpu.vector_store %arg12[%c0_50, %c0_51, %c0_52], %69 {strides = array<i32>} : memref<2x8x32xf32, #tpu.memory_space<vmem>>, vector<2x8x8xf32>,
    %c0_53 = arith.constant 0 : index
    %c0_54 = arith.constant 0 : index
    %c8 = arith.constant 8 : index
    %71 = vector.load %arg11[%c0_53, %c0_54, %c8] : memref<2x8x96xf32, #tpu.memory_space<vmem>>, vector<2x8x8xf32>
    %c0_55 = arith.constant 0 : index
    %c0_56 = arith.constant 0 : index
    %c40 = arith.constant 40 : index
    %72 = vector.load %arg11[%c0_55, %c0_56, %c40] : memref<2x8x96xf32, #tpu.memory_space<vmem>>, vector<2x8x8xf32>
    %c0_57 = arith.constant 0 : index
    %c0_58 = arith.constant 0 : index
    %c72 = arith.constant 72 : index
    %73 = vector.load %arg11[%c0_57, %c0_58, %c72] : memref<2x8x96xf32, #tpu.memory_space<vmem>>, vector<2x8x8xf32>
    %cst_59 = arith.constant dense<0.000000e+00> : vector<2x8x8xf32>
    %74 = tpu.matmul %71, %72, %cst_59 {dimension_numbers = #tpu.dot_dimension_numbers<[2], [2], [1], [1], [0, 0, 0, 1, 1, 1], [0], [0]>} : vector<2x8x8xf32>, vector<2x8x8xf32>, vector<2x8x8xf32> -> vector<2x8x8xf32>
    %75 = arith.addf %74, %29 : vector<2x8x8xf32>
    %cst_60 = arith.constant dense<0xFF800000> : vector<2x8xf32>
    %76 = vector.multi_reduction <maximumf>, %75, %cst_60 [2] : vector<2x8x8xf32> to vector<2x8xf32>
    %77 = vector.shape_cast %76 : vector<2x8xf32> to vector<2x8x1xf32>
    %78 = vector.broadcast %77 : vector<2x8x1xf32> to vector<2x8x8xf32>
    %79 = arith.subf %75, %78 : vector<2x8x8xf32>
    %80 = math.exp %79 : vector<2x8x8xf32>
    %cst_61 = arith.constant dense<0.000000e+00> : vector<2x8xf32>
    %81 = vector.multi_reduction <add>, %80, %cst_61 [2] : vector<2x8x8xf32> to vector<2x8xf32>
    %82 = vector.shape_cast %81 : vector<2x8xf32> to vector<2x8x1xf32>
    %83 = tpu.reciprocal %82 {approx = true} : vector<2x8x1xf32> -> vector<2x8x1xf32>
    %84 = vector.broadcast %83 : vector<2x8x1xf32> to vector<2x8x8xf32>
    %85 = arith.mulf %80, %84 : vector<2x8x8xf32>
    %cst_62 = arith.constant dense<0.000000e+00> : vector<2x8x8xf32>
    %86 = tpu.matmul %85, %73, %cst_62 {dimension_numbers = #tpu.dot_dimension_numbers<[2], [1], [1], [2], [0, 0, 0, 1, 1, 2], [0], [0]>} : vector<2x8x8xf32>, vector<2x8x8xf32>, vector<2x8x8xf32> -> vector<2x8x8xf32>
    %c0_63 = arith.constant 0 : index
    %c0_64 = arith.constant 0 : index
    %c8_65 = arith.constant 8 : index
    %87 = vector.load %arg12[%c0_63, %c0_64, %c8_65] : memref<2x8x32xf32, #tpu.memory_space<vmem>>, vector<2x8x8xf32>
    tpu.vector_store %arg12[%c0_63, %c0_64, %c8_65], %86 {strides = array<i32>} : memref<2x8x32xf32, #tpu.memory_space<vmem>>, vector<2x8x8xf32>,
    %c0_66 = arith.constant 0 : index
    %c0_67 = arith.constant 0 : index
    %c16 = arith.constant 16 : index
    %88 = vector.load %arg11[%c0_66, %c0_67, %c16] : memref<2x8x96xf32, #tpu.memory_space<vmem>>, vector<2x8x8xf32>
    %c0_68 = arith.constant 0 : index
    %c0_69 = arith.constant 0 : index
    %c48 = arith.constant 48 : index
    %89 = vector.load %arg11[%c0_68, %c0_69, %c48] : memref<2x8x96xf32, #tpu.memory_space<vmem>>, vector<2x8x8xf32>
    %c0_70 = arith.constant 0 : index
    %c0_71 = arith.constant 0 : index
    %c80 = arith.constant 80 : index
    %90 = vector.load %arg11[%c0_70, %c0_71, %c80] : memref<2x8x96xf32, #tpu.memory_space<vmem>>, vector<2x8x8xf32>
    %cst_72 = arith.constant dense<0.000000e+00> : vector<2x8x8xf32>
    %91 = tpu.matmul %88, %89, %cst_72 {dimension_numbers = #tpu.dot_dimension_numbers<[2], [2], [1], [1], [0, 0, 0, 1, 1, 1], [0], [0]>} : vector<2x8x8xf32>, vector<2x8x8xf32>, vector<2x8x8xf32> -> vector<2x8x8xf32>
    %92 = arith.addf %91, %29 : vector<2x8x8xf32>
    %cst_73 = arith.constant dense<0xFF800000> : vector<2x8xf32>
    %93 = vector.multi_reduction <maximumf>, %92, %cst_73 [2] : vector<2x8x8xf32> to vector<2x8xf32>
    %94 = vector.shape_cast %93 : vector<2x8xf32> to vector<2x8x1xf32>
    %95 = vector.broadcast %94 : vector<2x8x1xf32> to vector<2x8x8xf32>
    %96 = arith.subf %92, %95 : vector<2x8x8xf32>
    %97 = math.exp %96 : vector<2x8x8xf32>
    %cst_74 = arith.constant dense<0.000000e+00> : vector<2x8xf32>
    %98 = vector.multi_reduction <add>, %97, %cst_74 [2] : vector<2x8x8xf32> to vector<2x8xf32>
    %99 = vector.shape_cast %98 : vector<2x8xf32> to vector<2x8x1xf32>
    %100 = tpu.reciprocal %99 {approx = true} : vector<2x8x1xf32> -> vector<2x8x1xf32>
    %101 = vector.broadcast %100 : vector<2x8x1xf32> to vector<2x8x8xf32>
    %102 = arith.mulf %97, %101 : vector<2x8x8xf32>
    %cst_75 = arith.constant dense<0.000000e+00> : vector<2x8x8xf32>
    %103 = tpu.matmul %102, %90, %cst_75 {dimension_numbers = #tpu.dot_dimension_numbers<[2], [1], [1], [2], [0, 0, 0, 1, 1, 2], [0], [0]>} : vector<2x8x8xf32>, vector<2x8x8xf32>, vector<2x8x8xf32> -> vector<2x8x8xf32>
    %c0_76 = arith.constant 0 : index
    %c0_77 = arith.constant 0 : index
    %c16_78 = arith.constant 16 : index
    %104 = vector.load %arg12[%c0_76, %c0_77, %c16_78] : memref<2x8x32xf32, #tpu.memory_space<vmem>>, vector<2x8x8xf32>
    tpu.vector_store %arg12[%c0_76, %c0_77, %c16_78], %103 {strides = array<i32>} : memref<2x8x32xf32, #tpu.memory_space<vmem>>, vector<2x8x8xf32>,
    %c0_79 = arith.constant 0 : index
    %c0_80 = arith.constant 0 : index
    %c24 = arith.constant 24 : index
    %105 = vector.load %arg11[%c0_79, %c0_80, %c24] : memref<2x8x96xf32, #tpu.memory_space<vmem>>, vector<2x8x8xf32>
    %c0_81 = arith.constant 0 : index
    %c0_82 = arith.constant 0 : index
    %c56 = arith.constant 56 : index
    %106 = vector.load %arg11[%c0_81, %c0_82, %c56] : memref<2x8x96xf32, #tpu.memory_space<vmem>>, vector<2x8x8xf32>
    %c0_83 = arith.constant 0 : index
    %c0_84 = arith.constant 0 : index
    %c88 = arith.constant 88 : index
    %107 = vector.load %arg11[%c0_83, %c0_84, %c88] : memref<2x8x96xf32, #tpu.memory_space<vmem>>, vector<2x8x8xf32>
    %cst_85 = arith.constant dense<0.000000e+00> : vector<2x8x8xf32>
    %108 = tpu.matmul %105, %106, %cst_85 {dimension_numbers = #tpu.dot_dimension_numbers<[2], [2], [1], [1], [0, 0, 0, 1, 1, 1], [0], [0]>} : vector<2x8x8xf32>, vector<2x8x8xf32>, vector<2x8x8xf32> -> vector<2x8x8xf32>
    %109 = arith.addf %108, %29 : vector<2x8x8xf32>
    %cst_86 = arith.constant dense<0xFF800000> : vector<2x8xf32>
    %110 = vector.multi_reduction <maximumf>, %109, %cst_86 [2] : vector<2x8x8xf32> to vector<2x8xf32>
    %111 = vector.shape_cast %110 : vector<2x8xf32> to vector<2x8x1xf32>
    %112 = vector.broadcast %111 : vector<2x8x1xf32> to vector<2x8x8xf32>
    %113 = arith.subf %109, %112 : vector<2x8x8xf32>
    %114 = math.exp %113 : vector<2x8x8xf32>
    %cst_87 = arith.constant dense<0.000000e+00> : vector<2x8xf32>
    %115 = vector.multi_reduction <add>, %114, %cst_87 [2] : vector<2x8x8xf32> to vector<2x8xf32>
    %116 = vector.shape_cast %115 : vector<2x8xf32> to vector<2x8x1xf32>
    %117 = tpu.reciprocal %116 {approx = true} : vector<2x8x1xf32> -> vector<2x8x1xf32>
    %118 = vector.broadcast %117 : vector<2x8x1xf32> to vector<2x8x8xf32>
    %119 = arith.mulf %114, %118 : vector<2x8x8xf32>
    %cst_88 = arith.constant dense<0.000000e+00> : vector<2x8x8xf32>
    %120 = tpu.matmul %119, %107, %cst_88 {dimension_numbers = #tpu.dot_dimension_numbers<[2], [1], [1], [2], [0, 0, 0, 1, 1, 2], [0], [0]>} : vector<2x8x8xf32>, vector<2x8x8xf32>, vector<2x8x8xf32> -> vector<2x8x8xf32>
    %c0_89 = arith.constant 0 : index
    %c0_90 = arith.constant 0 : index
    %c24_91 = arith.constant 24 : index
    %121 = vector.load %arg12[%c0_89, %c0_90, %c24_91] : memref<2x8x32xf32, #tpu.memory_space<vmem>>, vector<2x8x8xf32>
    tpu.vector_store %arg12[%c0_89, %c0_90, %c24_91], %120 {strides = array<i32>} : memref<2x8x32xf32, #tpu.memory_space<vmem>>, vector<2x8x8xf32>,
    %c0_92 = arith.constant 0 : index
    %c0_93 = arith.constant 0 : index
    %c0_94 = arith.constant 0 : index
    %122 = vector.load %arg12[%c0_92, %c0_93, %c0_94] : memref<2x8x32xf32, #tpu.memory_space<vmem>>, vector<2x8x32xf32>
    %123 = vector.shape_cast %122 : vector<2x8x32xf32> to vector<16x32xf32>
    %124 = arith.truncf %123 : vector<16x32xf32> to vector<16x32xbf16>
    %c0_95 = arith.constant 0 : index
    %c0_96 = arith.constant 0 : index
    %c0_97 = arith.constant 0 : index
    %125 = vector.load %arg5[%c0_95, %c0_96, %c0_97] : memref<2x32x32xbf16, #tpu.memory_space<vmem>>, vector<1x32x32xbf16>
    %126 = vector.shape_cast %125 : vector<1x32x32xbf16> to vector<32x32xbf16>
    %cst_98 = arith.constant dense<0.000000e+00> : vector<16x32xf32>
    %127 = tpu.matmul %124, %126, %cst_98 {dimension_numbers = #tpu.dot_dimension_numbers<[1], [0], [0], [1], [0, 0, 1, 1], [], []>} : vector<16x32xbf16>, vector<32x32xbf16>, vector<16x32xf32> -> vector<16x32xf32>
    %128 = vector.broadcast %33 : vector<1x32xf32> to vector<16x32xf32>
    %129 = arith.addf %127, %128 : vector<16x32xf32>
    %130 = arith.addf %26, %129 : vector<16x32xf32>
    %cst_99 = arith.constant dense<0.000000e+00> : vector<16xf32>
    %131 = vector.multi_reduction <add>, %130, %cst_99 [1] : vector<16x32xf32> to vector<16xf32>
    %132 = vector.shape_cast %131 : vector<16xf32> to vector<16x1xf32>
    %cst_100 = arith.constant 3.200000e+01 : f32
    %133 = vector.broadcast %cst_100 : f32 to vector<16x1xf32>
    %134 = arith.divf %132, %133 : vector<16x1xf32>
    %135 = vector.broadcast %134 : vector<16x1xf32> to vector<16x32xf32>
    %136 = arith.subf %130, %135 : vector<16x32xf32>
    %137 = arith.mulf %136, %136 : vector<16x32xf32>
    %cst_101 = arith.constant dense<0.000000e+00> : vector<16xf32>
    %138 = vector.multi_reduction <add>, %137, %cst_101 [1] : vector<16x32xf32> to vector<16xf32>
    %139 = vector.shape_cast %138 : vector<16xf32> to vector<16x1xf32>
    %cst_102 = arith.constant 3.200000e+01 : f32
    %140 = vector.broadcast %cst_102 : f32 to vector<16x1xf32>
    %141 = arith.divf %139, %140 : vector<16x1xf32>
    %cst_103 = arith.constant 9.99999996E-13 : f32
    %142 = vector.broadcast %cst_103 : f32 to vector<16x1xf32>
    %143 = arith.addf %141, %142 : vector<16x1xf32>
    %144 = math.rsqrt %143 : vector<16x1xf32>
    %145 = vector.broadcast %134 : vector<16x1xf32> to vector<16x32xf32>
    %146 = arith.subf %130, %145 : vector<16x32xf32>
    %147 = vector.broadcast %144 : vector<16x1xf32> to vector<16x32xf32>
    %148 = arith.mulf %146, %147 : vector<16x32xf32>
    %149 = vector.broadcast %35 : vector<1x32xf32> to vector<16x32xf32>
    %150 = arith.mulf %148, %149 : vector<16x32xf32>
    %151 = vector.broadcast %37 : vector<1x32xf32> to vector<16x32xf32>
    %152 = arith.addf %150, %151 : vector<16x32xf32>
    %153 = arith.truncf %152 : vector<16x32xf32> to vector<16x32xbf16>
    %c0_104 = arith.constant 0 : index
    %c0_105 = arith.constant 0 : index
    %c0_106 = arith.constant 0 : index
    %154 = vector.load %arg6[%c0_104, %c0_105, %c0_106] : memref<2x32x64xbf16, #tpu.memory_space<vmem>>, vector<1x32x64xbf16>
    %155 = vector.shape_cast %154 : vector<1x32x64xbf16> to vector<32x64xbf16>
    %cst_107 = arith.constant dense<0.000000e+00> : vector<16x64xf32>
    %156 = tpu.matmul %153, %155, %cst_107 {dimension_numbers = #tpu.dot_dimension_numbers<[1], [0], [0], [1], [0, 0, 1, 1], [], []>} : vector<16x32xbf16>, vector<32x64xbf16>, vector<16x64xf32> -> vector<16x64xf32>
    %157 = vector.broadcast %39 : vector<1x64xf32> to vector<16x64xf32>
    %158 = arith.addf %156, %157 : vector<16x64xf32>
    %cst_108 = arith.constant 5.000000e-01 : f32
    %159 = vector.broadcast %cst_108 : f32 to vector<16x64xf32>
    %160 = arith.mulf %159, %158 : vector<16x64xf32>
    %cst_109 = arith.constant 4.471500e-02 : f32
    %161 = vector.broadcast %cst_109 : f32 to vector<16x64xf32>
    %162 = arith.mulf %161, %158 : vector<16x64xf32>
    %163 = arith.mulf %162, %158 : vector<16x64xf32>
    %164 = arith.mulf %163, %158 : vector<16x64xf32>
    %165 = arith.addf %158, %164 : vector<16x64xf32>
    %cst_110 = arith.constant 0.797884583 : f32
    %166 = vector.broadcast %cst_110 : f32 to vector<16x64xf32>
    %167 = arith.mulf %166, %165 : vector<16x64xf32>
    %168 = math.tanh %167 : vector<16x64xf32>
    %cst_111 = arith.constant 1.000000e+00 : f32
    %169 = vector.broadcast %cst_111 : f32 to vector<16x64xf32>
    %170 = arith.addf %169, %168 : vector<16x64xf32>
    %171 = arith.mulf %160, %170 : vector<16x64xf32>
    %172 = arith.truncf %171 : vector<16x64xf32> to vector<16x64xbf16>
    %c0_112 = arith.constant 0 : index
    %c0_113 = arith.constant 0 : index
    %c0_114 = arith.constant 0 : index
    %173 = vector.load %arg7[%c0_112, %c0_113, %c0_114] : memref<2x64x32xbf16, #tpu.memory_space<vmem>>, vector<1x64x32xbf16>
    %174 = vector.shape_cast %173 : vector<1x64x32xbf16> to vector<64x32xbf16>
    %cst_115 = arith.constant dense<0.000000e+00> : vector<16x32xf32>
    %175 = tpu.matmul %172, %174, %cst_115 {dimension_numbers = #tpu.dot_dimension_numbers<[1], [0], [0], [1], [0, 0, 1, 1], [], []>} : vector<16x64xbf16>, vector<64x32xbf16>, vector<16x32xf32> -> vector<16x32xf32>
    %176 = vector.broadcast %41 : vector<1x32xf32> to vector<16x32xf32>
    %177 = arith.addf %175, %176 : vector<16x32xf32>
    %178 = arith.addf %152, %177 : vector<16x32xf32>
    %cst_116 = arith.constant dense<0.000000e+00> : vector<16xf32>
    %179 = vector.multi_reduction <add>, %178, %cst_116 [1] : vector<16x32xf32> to vector<16xf32>
    %180 = vector.shape_cast %179 : vector<16xf32> to vector<16x1xf32>
    %cst_117 = arith.constant 3.200000e+01 : f32
    %181 = vector.broadcast %cst_117 : f32 to vector<16x1xf32>
    %182 = arith.divf %180, %181 : vector<16x1xf32>
    %183 = vector.broadcast %182 : vector<16x1xf32> to vector<16x32xf32>
    %184 = arith.subf %178, %183 : vector<16x32xf32>
    %185 = arith.mulf %184, %184 : vector<16x32xf32>
    %cst_118 = arith.constant dense<0.000000e+00> : vector<16xf32>
    %186 = vector.multi_reduction <add>, %185, %cst_118 [1] : vector<16x32xf32> to vector<16xf32>
    %187 = vector.shape_cast %186 : vector<16xf32> to vector<16x1xf32>
    %cst_119 = arith.constant 3.200000e+01 : f32
    %188 = vector.broadcast %cst_119 : f32 to vector<16x1xf32>
    %189 = arith.divf %187, %188 : vector<16x1xf32>
    %cst_120 = arith.constant 9.99999996E-13 : f32
    %190 = vector.broadcast %cst_120 : f32 to vector<16x1xf32>
    %191 = arith.addf %189, %190 : vector<16x1xf32>
    %192 = math.rsqrt %191 : vector<16x1xf32>
    %193 = vector.broadcast %182 : vector<16x1xf32> to vector<16x32xf32>
    %194 = arith.subf %178, %193 : vector<16x32xf32>
    %195 = vector.broadcast %192 : vector<16x1xf32> to vector<16x32xf32>
    %196 = arith.mulf %194, %195 : vector<16x32xf32>
    %197 = vector.broadcast %43 : vector<1x32xf32> to vector<16x32xf32>
    %198 = arith.mulf %196, %197 : vector<16x32xf32>
    %199 = vector.broadcast %45 : vector<1x32xf32> to vector<16x32xf32>
    %200 = arith.addf %198, %199 : vector<16x32xf32>
    %c1 = arith.constant 1 : index
    %c0_121 = arith.constant 0 : index
    %c0_122 = arith.constant 0 : index
    %201 = vector.load %arg8[%c1, %c0_121, %c0_122] : memref<2x1x352xf32, #tpu.memory_space<vmem>>, vector<1x1x96xf32>
    %202 = vector.shape_cast %201 : vector<1x1x96xf32> to vector<1x96xf32>
    %c1_123 = arith.constant 1 : index
    %c0_124 = arith.constant 0 : index
    %c96_125 = arith.constant 96 : index
    %203 = vector.load %arg8[%c1_123, %c0_124, %c96_125] : memref<2x1x352xf32, #tpu.memory_space<vmem>>, vector<1x1x32xf32>
    %204 = vector.shape_cast %203 : vector<1x1x32xf32> to vector<1x32xf32>
    %c1_126 = arith.constant 1 : index
    %c0_127 = arith.constant 0 : index
    %c128_128 = arith.constant 128 : index
    %205 = vector.load %arg8[%c1_126, %c0_127, %c128_128] : memref<2x1x352xf32, #tpu.memory_space<vmem>>, vector<1x1x32xf32>
    %206 = vector.shape_cast %205 : vector<1x1x32xf32> to vector<1x32xf32>
    %c1_129 = arith.constant 1 : index
    %c0_130 = arith.constant 0 : index
    %c160_131 = arith.constant 160 : index
    %207 = vector.load %arg8[%c1_129, %c0_130, %c160_131] : memref<2x1x352xf32, #tpu.memory_space<vmem>>, vector<1x1x32xf32>
    %208 = vector.shape_cast %207 : vector<1x1x32xf32> to vector<1x32xf32>
    %c1_132 = arith.constant 1 : index
    %c0_133 = arith.constant 0 : index
    %c192_134 = arith.constant 192 : index
    %209 = vector.load %arg8[%c1_132, %c0_133, %c192_134] : memref<2x1x352xf32, #tpu.memory_space<vmem>>, vector<1x1x64xf32>
    %210 = vector.shape_cast %209 : vector<1x1x64xf32> to vector<1x64xf32>
    %c1_135 = arith.constant 1 : index
    %c0_136 = arith.constant 0 : index
    %c256_137 = arith.constant 256 : index
    %211 = vector.load %arg8[%c1_135, %c0_136, %c256_137] : memref<2x1x352xf32, #tpu.memory_space<vmem>>, vector<1x1x32xf32>
    %212 = vector.shape_cast %211 : vector<1x1x32xf32> to vector<1x32xf32>
    %c1_138 = arith.constant 1 : index
    %c0_139 = arith.constant 0 : index
    %c288_140 = arith.constant 288 : index
    %213 = vector.load %arg8[%c1_138, %c0_139, %c288_140] : memref<2x1x352xf32, #tpu.memory_space<vmem>>, vector<1x1x32xf32>
    %214 = vector.shape_cast %213 : vector<1x1x32xf32> to vector<1x32xf32>
    %c1_141 = arith.constant 1 : index
    %c0_142 = arith.constant 0 : index
    %c320_143 = arith.constant 320 : index
    %215 = vector.load %arg8[%c1_141, %c0_142, %c320_143] : memref<2x1x352xf32, #tpu.memory_space<vmem>>, vector<1x1x32xf32>
    %216 = vector.shape_cast %215 : vector<1x1x32xf32> to vector<1x32xf32>
    %217 = arith.truncf %200 : vector<16x32xf32> to vector<16x32xbf16>
    %c1_144 = arith.constant 1 : index
    %c0_145 = arith.constant 0 : index
    %c0_146 = arith.constant 0 : index
    %218 = vector.load %arg4[%c1_144, %c0_145, %c0_146] : memref<2x32x96xbf16, #tpu.memory_space<vmem>>, vector<1x32x96xbf16>
    %219 = vector.shape_cast %218 : vector<1x32x96xbf16> to vector<32x96xbf16>
    %cst_147 = arith.constant dense<0.000000e+00> : vector<16x96xf32>
    %220 = tpu.matmul %217, %219, %cst_147 {dimension_numbers = #tpu.dot_dimension_numbers<[1], [0], [0], [1], [0, 0, 1, 1], [], []>} : vector<16x32xbf16>, vector<32x96xbf16>, vector<16x96xf32> -> vector<16x96xf32>
    %221 = vector.broadcast %202 : vector<1x96xf32> to vector<16x96xf32>
    %222 = arith.addf %220, %221 : vector<16x96xf32>
    %223 = vector.shape_cast %222 : vector<16x96xf32> to vector<2x8x96xf32>
    %c0_148 = arith.constant 0 : index
    %c0_149 = arith.constant 0 : index
    %c0_150 = arith.constant 0 : index
    %224 = vector.load %arg11[%c0_148, %c0_149, %c0_150] : memref<2x8x96xf32, #tpu.memory_space<vmem>>, vector<2x8x96xf32>
    tpu.vector_store %arg11[%c0_148, %c0_149, %c0_150], %223 {strides = array<i32>} : memref<2x8x96xf32, #tpu.memory_space<vmem>>, vector<2x8x96xf32>,
    %c0_151 = arith.constant 0 : index
    %c0_152 = arith.constant 0 : index
    %c0_153 = arith.constant 0 : index
    %225 = vector.load %arg11[%c0_151, %c0_152, %c0_153] : memref<2x8x96xf32, #tpu.memory_space<vmem>>, vector<2x8x8xf32>
    %c0_154 = arith.constant 0 : index
    %c0_155 = arith.constant 0 : index
    %c32_156 = arith.constant 32 : index
    %226 = vector.load %arg11[%c0_154, %c0_155, %c32_156] : memref<2x8x96xf32, #tpu.memory_space<vmem>>, vector<2x8x8xf32>
    %c0_157 = arith.constant 0 : index
    %c0_158 = arith.constant 0 : index
    %c64_159 = arith.constant 64 : index
    %227 = vector.load %arg11[%c0_157, %c0_158, %c64_159] : memref<2x8x96xf32, #tpu.memory_space<vmem>>, vector<2x8x8xf32>
    %cst_160 = arith.constant dense<0.000000e+00> : vector<2x8x8xf32>
    %228 = tpu.matmul %225, %226, %cst_160 {dimension_numbers = #tpu.dot_dimension_numbers<[2], [2], [1], [1], [0, 0, 0, 1, 1, 1], [0], [0]>} : vector<2x8x8xf32>, vector<2x8x8xf32>, vector<2x8x8xf32> -> vector<2x8x8xf32>
    %229 = arith.addf %228, %29 : vector<2x8x8xf32>
    %cst_161 = arith.constant dense<0xFF800000> : vector<2x8xf32>
    %230 = vector.multi_reduction <maximumf>, %229, %cst_161 [2] : vector<2x8x8xf32> to vector<2x8xf32>
    %231 = vector.shape_cast %230 : vector<2x8xf32> to vector<2x8x1xf32>
    %232 = vector.broadcast %231 : vector<2x8x1xf32> to vector<2x8x8xf32>
    %233 = arith.subf %229, %232 : vector<2x8x8xf32>
    %234 = math.exp %233 : vector<2x8x8xf32>
    %cst_162 = arith.constant dense<0.000000e+00> : vector<2x8xf32>
    %235 = vector.multi_reduction <add>, %234, %cst_162 [2] : vector<2x8x8xf32> to vector<2x8xf32>
    %236 = vector.shape_cast %235 : vector<2x8xf32> to vector<2x8x1xf32>
    %237 = tpu.reciprocal %236 {approx = true} : vector<2x8x1xf32> -> vector<2x8x1xf32>
    %238 = vector.broadcast %237 : vector<2x8x1xf32> to vector<2x8x8xf32>
    %239 = arith.mulf %234, %238 : vector<2x8x8xf32>
    %cst_163 = arith.constant dense<0.000000e+00> : vector<2x8x8xf32>
    %240 = tpu.matmul %239, %227, %cst_163 {dimension_numbers = #tpu.dot_dimension_numbers<[2], [1], [1], [2], [0, 0, 0, 1, 1, 2], [0], [0]>} : vector<2x8x8xf32>, vector<2x8x8xf32>, vector<2x8x8xf32> -> vector<2x8x8xf32>
    %c0_164 = arith.constant 0 : index
    %c0_165 = arith.constant 0 : index
    %c0_166 = arith.constant 0 : index
    %241 = vector.load %arg12[%c0_164, %c0_165, %c0_166] : memref<2x8x32xf32, #tpu.memory_space<vmem>>, vector<2x8x8xf32>
    tpu.vector_store %arg12[%c0_164, %c0_165, %c0_166], %240 {strides = array<i32>} : memref<2x8x32xf32, #tpu.memory_space<vmem>>, vector<2x8x8xf32>,
    %c0_167 = arith.constant 0 : index
    %c0_168 = arith.constant 0 : index
    %c8_169 = arith.constant 8 : index
    %242 = vector.load %arg11[%c0_167, %c0_168, %c8_169] : memref<2x8x96xf32, #tpu.memory_space<vmem>>, vector<2x8x8xf32>
    %c0_170 = arith.constant 0 : index
    %c0_171 = arith.constant 0 : index
    %c40_172 = arith.constant 40 : index
    %243 = vector.load %arg11[%c0_170, %c0_171, %c40_172] : memref<2x8x96xf32, #tpu.memory_space<vmem>>, vector<2x8x8xf32>
    %c0_173 = arith.constant 0 : index
    %c0_174 = arith.constant 0 : index
    %c72_175 = arith.constant 72 : index
    %244 = vector.load %arg11[%c0_173, %c0_174, %c72_175] : memref<2x8x96xf32, #tpu.memory_space<vmem>>, vector<2x8x8xf32>
    %cst_176 = arith.constant dense<0.000000e+00> : vector<2x8x8xf32>
    %245 = tpu.matmul %242, %243, %cst_176 {dimension_numbers = #tpu.dot_dimension_numbers<[2], [2], [1], [1], [0, 0, 0, 1, 1, 1], [0], [0]>} : vector<2x8x8xf32>, vector<2x8x8xf32>, vector<2x8x8xf32> -> vector<2x8x8xf32>
    %246 = arith.addf %245, %29 : vector<2x8x8xf32>
    %cst_177 = arith.constant dense<0xFF800000> : vector<2x8xf32>
    %247 = vector.multi_reduction <maximumf>, %246, %cst_177 [2] : vector<2x8x8xf32> to vector<2x8xf32>
    %248 = vector.shape_cast %247 : vector<2x8xf32> to vector<2x8x1xf32>
    %249 = vector.broadcast %248 : vector<2x8x1xf32> to vector<2x8x8xf32>
    %250 = arith.subf %246, %249 : vector<2x8x8xf32>
    %251 = math.exp %250 : vector<2x8x8xf32>
    %cst_178 = arith.constant dense<0.000000e+00> : vector<2x8xf32>
    %252 = vector.multi_reduction <add>, %251, %cst_178 [2] : vector<2x8x8xf32> to vector<2x8xf32>
    %253 = vector.shape_cast %252 : vector<2x8xf32> to vector<2x8x1xf32>
    %254 = tpu.reciprocal %253 {approx = true} : vector<2x8x1xf32> -> vector<2x8x1xf32>
    %255 = vector.broadcast %254 : vector<2x8x1xf32> to vector<2x8x8xf32>
    %256 = arith.mulf %251, %255 : vector<2x8x8xf32>
    %cst_179 = arith.constant dense<0.000000e+00> : vector<2x8x8xf32>
    %257 = tpu.matmul %256, %244, %cst_179 {dimension_numbers = #tpu.dot_dimension_numbers<[2], [1], [1], [2], [0, 0, 0, 1, 1, 2], [0], [0]>} : vector<2x8x8xf32>, vector<2x8x8xf32>, vector<2x8x8xf32> -> vector<2x8x8xf32>
    %c0_180 = arith.constant 0 : index
    %c0_181 = arith.constant 0 : index
    %c8_182 = arith.constant 8 : index
    %258 = vector.load %arg12[%c0_180, %c0_181, %c8_182] : memref<2x8x32xf32, #tpu.memory_space<vmem>>, vector<2x8x8xf32>
    tpu.vector_store %arg12[%c0_180, %c0_181, %c8_182], %257 {strides = array<i32>} : memref<2x8x32xf32, #tpu.memory_space<vmem>>, vector<2x8x8xf32>,
    %c0_183 = arith.constant 0 : index
    %c0_184 = arith.constant 0 : index
    %c16_185 = arith.constant 16 : index
    %259 = vector.load %arg11[%c0_183, %c0_184, %c16_185] : memref<2x8x96xf32, #tpu.memory_space<vmem>>, vector<2x8x8xf32>
    %c0_186 = arith.constant 0 : index
    %c0_187 = arith.constant 0 : index
    %c48_188 = arith.constant 48 : index
    %260 = vector.load %arg11[%c0_186, %c0_187, %c48_188] : memref<2x8x96xf32, #tpu.memory_space<vmem>>, vector<2x8x8xf32>
    %c0_189 = arith.constant 0 : index
    %c0_190 = arith.constant 0 : index
    %c80_191 = arith.constant 80 : index
    %261 = vector.load %arg11[%c0_189, %c0_190, %c80_191] : memref<2x8x96xf32, #tpu.memory_space<vmem>>, vector<2x8x8xf32>
    %cst_192 = arith.constant dense<0.000000e+00> : vector<2x8x8xf32>
    %262 = tpu.matmul %259, %260, %cst_192 {dimension_numbers = #tpu.dot_dimension_numbers<[2], [2], [1], [1], [0, 0, 0, 1, 1, 1], [0], [0]>} : vector<2x8x8xf32>, vector<2x8x8xf32>, vector<2x8x8xf32> -> vector<2x8x8xf32>
    %263 = arith.addf %262, %29 : vector<2x8x8xf32>
    %cst_193 = arith.constant dense<0xFF800000> : vector<2x8xf32>
    %264 = vector.multi_reduction <maximumf>, %263, %cst_193 [2] : vector<2x8x8xf32> to vector<2x8xf32>
    %265 = vector.shape_cast %264 : vector<2x8xf32> to vector<2x8x1xf32>
    %266 = vector.broadcast %265 : vector<2x8x1xf32> to vector<2x8x8xf32>
    %267 = arith.subf %263, %266 : vector<2x8x8xf32>
    %268 = math.exp %267 : vector<2x8x8xf32>
    %cst_194 = arith.constant dense<0.000000e+00> : vector<2x8xf32>
    %269 = vector.multi_reduction <add>, %268, %cst_194 [2] : vector<2x8x8xf32> to vector<2x8xf32>
    %270 = vector.shape_cast %269 : vector<2x8xf32> to vector<2x8x1xf32>
    %271 = tpu.reciprocal %270 {approx = true} : vector<2x8x1xf32> -> vector<2x8x1xf32>
    %272 = vector.broadcast %271 : vector<2x8x1xf32> to vector<2x8x8xf32>
    %273 = arith.mulf %268, %272 : vector<2x8x8xf32>
    %cst_195 = arith.constant dense<0.000000e+00> : vector<2x8x8xf32>
    %274 = tpu.matmul %273, %261, %cst_195 {dimension_numbers = #tpu.dot_dimension_numbers<[2], [1], [1], [2], [0, 0, 0, 1, 1, 2], [0], [0]>} : vector<2x8x8xf32>, vector<2x8x8xf32>, vector<2x8x8xf32> -> vector<2x8x8xf32>
    %c0_196 = arith.constant 0 : index
    %c0_197 = arith.constant 0 : index
    %c16_198 = arith.constant 16 : index
    %275 = vector.load %arg12[%c0_196, %c0_197, %c16_198] : memref<2x8x32xf32, #tpu.memory_space<vmem>>, vector<2x8x8xf32>
    tpu.vector_store %arg12[%c0_196, %c0_197, %c16_198], %274 {strides = array<i32>} : memref<2x8x32xf32, #tpu.memory_space<vmem>>, vector<2x8x8xf32>,
    %c0_199 = arith.constant 0 : index
    %c0_200 = arith.constant 0 : index
    %c24_201 = arith.constant 24 : index
    %276 = vector.load %arg11[%c0_199, %c0_200, %c24_201] : memref<2x8x96xf32, #tpu.memory_space<vmem>>, vector<2x8x8xf32>
    %c0_202 = arith.constant 0 : index
    %c0_203 = arith.constant 0 : index
    %c56_204 = arith.constant 56 : index
    %277 = vector.load %arg11[%c0_202, %c0_203, %c56_204] : memref<2x8x96xf32, #tpu.memory_space<vmem>>, vector<2x8x8xf32>
    %c0_205 = arith.constant 0 : index
    %c0_206 = arith.constant 0 : index
    %c88_207 = arith.constant 88 : index
    %278 = vector.load %arg11[%c0_205, %c0_206, %c88_207] : memref<2x8x96xf32, #tpu.memory_space<vmem>>, vector<2x8x8xf32>
    %cst_208 = arith.constant dense<0.000000e+00> : vector<2x8x8xf32>
    %279 = tpu.matmul %276, %277, %cst_208 {dimension_numbers = #tpu.dot_dimension_numbers<[2], [2], [1], [1], [0, 0, 0, 1, 1, 1], [0], [0]>} : vector<2x8x8xf32>, vector<2x8x8xf32>, vector<2x8x8xf32> -> vector<2x8x8xf32>
    %280 = arith.addf %279, %29 : vector<2x8x8xf32>
    %cst_209 = arith.constant dense<0xFF800000> : vector<2x8xf32>
    %281 = vector.multi_reduction <maximumf>, %280, %cst_209 [2] : vector<2x8x8xf32> to vector<2x8xf32>
    %282 = vector.shape_cast %281 : vector<2x8xf32> to vector<2x8x1xf32>
    %283 = vector.broadcast %282 : vector<2x8x1xf32> to vector<2x8x8xf32>
    %284 = arith.subf %280, %283 : vector<2x8x8xf32>
    %285 = math.exp %284 : vector<2x8x8xf32>
    %cst_210 = arith.constant dense<0.000000e+00> : vector<2x8xf32>
    %286 = vector.multi_reduction <add>, %285, %cst_210 [2] : vector<2x8x8xf32> to vector<2x8xf32>
    %287 = vector.shape_cast %286 : vector<2x8xf32> to vector<2x8x1xf32>
    %288 = tpu.reciprocal %287 {approx = true} : vector<2x8x1xf32> -> vector<2x8x1xf32>
    %289 = vector.broadcast %288 : vector<2x8x1xf32> to vector<2x8x8xf32>
    %290 = arith.mulf %285, %289 : vector<2x8x8xf32>
    %cst_211 = arith.constant dense<0.000000e+00> : vector<2x8x8xf32>
    %291 = tpu.matmul %290, %278, %cst_211 {dimension_numbers = #tpu.dot_dimension_numbers<[2], [1], [1], [2], [0, 0, 0, 1, 1, 2], [0], [0]>} : vector<2x8x8xf32>, vector<2x8x8xf32>, vector<2x8x8xf32> -> vector<2x8x8xf32>
    %c0_212 = arith.constant 0 : index
    %c0_213 = arith.constant 0 : index
    %c24_214 = arith.constant 24 : index
    %292 = vector.load %arg12[%c0_212, %c0_213, %c24_214] : memref<2x8x32xf32, #tpu.memory_space<vmem>>, vector<2x8x8xf32>
    tpu.vector_store %arg12[%c0_212, %c0_213, %c24_214], %291 {strides = array<i32>} : memref<2x8x32xf32, #tpu.memory_space<vmem>>, vector<2x8x8xf32>,
    %c0_215 = arith.constant 0 : index
    %c0_216 = arith.constant 0 : index
    %c0_217 = arith.constant 0 : index
    %293 = vector.load %arg12[%c0_215, %c0_216, %c0_217] : memref<2x8x32xf32, #tpu.memory_space<vmem>>, vector<2x8x32xf32>
    %294 = vector.shape_cast %293 : vector<2x8x32xf32> to vector<16x32xf32>
    %295 = arith.truncf %294 : vector<16x32xf32> to vector<16x32xbf16>
    %c1_218 = arith.constant 1 : index
    %c0_219 = arith.constant 0 : index
    %c0_220 = arith.constant 0 : index
    %296 = vector.load %arg5[%c1_218, %c0_219, %c0_220] : memref<2x32x32xbf16, #tpu.memory_space<vmem>>, vector<1x32x32xbf16>
    %297 = vector.shape_cast %296 : vector<1x32x32xbf16> to vector<32x32xbf16>
    %cst_221 = arith.constant dense<0.000000e+00> : vector<16x32xf32>
    %298 = tpu.matmul %295, %297, %cst_221 {dimension_numbers = #tpu.dot_dimension_numbers<[1], [0], [0], [1], [0, 0, 1, 1], [], []>} : vector<16x32xbf16>, vector<32x32xbf16>, vector<16x32xf32> -> vector<16x32xf32>
    %299 = vector.broadcast %204 : vector<1x32xf32> to vector<16x32xf32>
    %300 = arith.addf %298, %299 : vector<16x32xf32>
    %301 = arith.addf %200, %300 : vector<16x32xf32>
    %cst_222 = arith.constant dense<0.000000e+00> : vector<16xf32>
    %302 = vector.multi_reduction <add>, %301, %cst_222 [1] : vector<16x32xf32> to vector<16xf32>
    %303 = vector.shape_cast %302 : vector<16xf32> to vector<16x1xf32>
    %cst_223 = arith.constant 3.200000e+01 : f32
    %304 = vector.broadcast %cst_223 : f32 to vector<16x1xf32>
    %305 = arith.divf %303, %304 : vector<16x1xf32>
    %306 = vector.broadcast %305 : vector<16x1xf32> to vector<16x32xf32>
    %307 = arith.subf %301, %306 : vector<16x32xf32>
    %308 = arith.mulf %307, %307 : vector<16x32xf32>
    %cst_224 = arith.constant dense<0.000000e+00> : vector<16xf32>
    %309 = vector.multi_reduction <add>, %308, %cst_224 [1] : vector<16x32xf32> to vector<16xf32>
    %310 = vector.shape_cast %309 : vector<16xf32> to vector<16x1xf32>
    %cst_225 = arith.constant 3.200000e+01 : f32
    %311 = vector.broadcast %cst_225 : f32 to vector<16x1xf32>
    %312 = arith.divf %310, %311 : vector<16x1xf32>
    %cst_226 = arith.constant 9.99999996E-13 : f32
    %313 = vector.broadcast %cst_226 : f32 to vector<16x1xf32>
    %314 = arith.addf %312, %313 : vector<16x1xf32>
    %315 = math.rsqrt %314 : vector<16x1xf32>
    %316 = vector.broadcast %305 : vector<16x1xf32> to vector<16x32xf32>
    %317 = arith.subf %301, %316 : vector<16x32xf32>
    %318 = vector.broadcast %315 : vector<16x1xf32> to vector<16x32xf32>
    %319 = arith.mulf %317, %318 : vector<16x32xf32>
    %320 = vector.broadcast %206 : vector<1x32xf32> to vector<16x32xf32>
    %321 = arith.mulf %319, %320 : vector<16x32xf32>
    %322 = vector.broadcast %208 : vector<1x32xf32> to vector<16x32xf32>
    %323 = arith.addf %321, %322 : vector<16x32xf32>
    %324 = arith.truncf %323 : vector<16x32xf32> to vector<16x32xbf16>
    %c1_227 = arith.constant 1 : index
    %c0_228 = arith.constant 0 : index
    %c0_229 = arith.constant 0 : index
    %325 = vector.load %arg6[%c1_227, %c0_228, %c0_229] : memref<2x32x64xbf16, #tpu.memory_space<vmem>>, vector<1x32x64xbf16>
    %326 = vector.shape_cast %325 : vector<1x32x64xbf16> to vector<32x64xbf16>
    %cst_230 = arith.constant dense<0.000000e+00> : vector<16x64xf32>
    %327 = tpu.matmul %324, %326, %cst_230 {dimension_numbers = #tpu.dot_dimension_numbers<[1], [0], [0], [1], [0, 0, 1, 1], [], []>} : vector<16x32xbf16>, vector<32x64xbf16>, vector<16x64xf32> -> vector<16x64xf32>
    %328 = vector.broadcast %210 : vector<1x64xf32> to vector<16x64xf32>
    %329 = arith.addf %327, %328 : vector<16x64xf32>
    %cst_231 = arith.constant 5.000000e-01 : f32
    %330 = vector.broadcast %cst_231 : f32 to vector<16x64xf32>
    %331 = arith.mulf %330, %329 : vector<16x64xf32>
    %cst_232 = arith.constant 4.471500e-02 : f32
    %332 = vector.broadcast %cst_232 : f32 to vector<16x64xf32>
    %333 = arith.mulf %332, %329 : vector<16x64xf32>
    %334 = arith.mulf %333, %329 : vector<16x64xf32>
    %335 = arith.mulf %334, %329 : vector<16x64xf32>
    %336 = arith.addf %329, %335 : vector<16x64xf32>
    %cst_233 = arith.constant 0.797884583 : f32
    %337 = vector.broadcast %cst_233 : f32 to vector<16x64xf32>
    %338 = arith.mulf %337, %336 : vector<16x64xf32>
    %339 = math.tanh %338 : vector<16x64xf32>
    %cst_234 = arith.constant 1.000000e+00 : f32
    %340 = vector.broadcast %cst_234 : f32 to vector<16x64xf32>
    %341 = arith.addf %340, %339 : vector<16x64xf32>
    %342 = arith.mulf %331, %341 : vector<16x64xf32>
    %343 = arith.truncf %342 : vector<16x64xf32> to vector<16x64xbf16>
    %c1_235 = arith.constant 1 : index
    %c0_236 = arith.constant 0 : index
    %c0_237 = arith.constant 0 : index
    %344 = vector.load %arg7[%c1_235, %c0_236, %c0_237] : memref<2x64x32xbf16, #tpu.memory_space<vmem>>, vector<1x64x32xbf16>
    %345 = vector.shape_cast %344 : vector<1x64x32xbf16> to vector<64x32xbf16>
    %cst_238 = arith.constant dense<0.000000e+00> : vector<16x32xf32>
    %346 = tpu.matmul %343, %345, %cst_238 {dimension_numbers = #tpu.dot_dimension_numbers<[1], [0], [0], [1], [0, 0, 1, 1], [], []>} : vector<16x64xbf16>, vector<64x32xbf16>, vector<16x32xf32> -> vector<16x32xf32>
    %347 = vector.broadcast %212 : vector<1x32xf32> to vector<16x32xf32>
    %348 = arith.addf %346, %347 : vector<16x32xf32>
    %349 = arith.addf %323, %348 : vector<16x32xf32>
    %cst_239 = arith.constant dense<0.000000e+00> : vector<16xf32>
    %350 = vector.multi_reduction <add>, %349, %cst_239 [1] : vector<16x32xf32> to vector<16xf32>
    %351 = vector.shape_cast %350 : vector<16xf32> to vector<16x1xf32>
    %cst_240 = arith.constant 3.200000e+01 : f32
    %352 = vector.broadcast %cst_240 : f32 to vector<16x1xf32>
    %353 = arith.divf %351, %352 : vector<16x1xf32>
    %354 = vector.broadcast %353 : vector<16x1xf32> to vector<16x32xf32>
    %355 = arith.subf %349, %354 : vector<16x32xf32>
    %356 = arith.mulf %355, %355 : vector<16x32xf32>
    %cst_241 = arith.constant dense<0.000000e+00> : vector<16xf32>
    %357 = vector.multi_reduction <add>, %356, %cst_241 [1] : vector<16x32xf32> to vector<16xf32>
    %358 = vector.shape_cast %357 : vector<16xf32> to vector<16x1xf32>
    %cst_242 = arith.constant 3.200000e+01 : f32
    %359 = vector.broadcast %cst_242 : f32 to vector<16x1xf32>
    %360 = arith.divf %358, %359 : vector<16x1xf32>
    %cst_243 = arith.constant 9.99999996E-13 : f32
    %361 = vector.broadcast %cst_243 : f32 to vector<16x1xf32>
    %362 = arith.addf %360, %361 : vector<16x1xf32>
    %363 = math.rsqrt %362 : vector<16x1xf32>
    %364 = vector.broadcast %353 : vector<16x1xf32> to vector<16x32xf32>
    %365 = arith.subf %349, %364 : vector<16x32xf32>
    %366 = vector.broadcast %363 : vector<16x1xf32> to vector<16x32xf32>
    %367 = arith.mulf %365, %366 : vector<16x32xf32>
    %368 = vector.broadcast %214 : vector<1x32xf32> to vector<16x32xf32>
    %369 = arith.mulf %367, %368 : vector<16x32xf32>
    %370 = vector.broadcast %216 : vector<1x32xf32> to vector<16x32xf32>
    %371 = arith.addf %369, %370 : vector<16x32xf32>
    %372 = vector.shape_cast %371 : vector<16x32xf32> to vector<2x8x32xf32>
    %373 = vector.extract_strided_slice %372 {offsets = [0, 0, 0], sizes = [2, 1, 32], strides = [1, 1, 1]} : vector<2x8x32xf32> to vector<2x1x32xf32>
    %374 = vector.shape_cast %373 : vector<2x1x32xf32> to vector<2x32xf32>
    %375 = arith.truncf %374 : vector<2x32xf32> to vector<2x32xbf16>
    %c0_244 = arith.constant 0 : index
    %c0_245 = arith.constant 0 : index
    %376 = vector.load %arg9[%c0_244, %c0_245] : memref<32x16xbf16, #tpu.memory_space<vmem>>, vector<32x16xbf16>
    %cst_246 = arith.constant dense<0.000000e+00> : vector<2x16xf32>
    %377 = tpu.matmul %375, %376, %cst_246 {dimension_numbers = #tpu.dot_dimension_numbers<[1], [0], [0], [1], [0, 0, 1, 1], [], []>} : vector<2x32xbf16>, vector<32x16xbf16>, vector<2x16xf32> -> vector<2x16xf32>
    %378 = vector.broadcast %4 : vector<1x16xf32> to vector<2x16xf32>
    %379 = arith.addf %377, %378 : vector<2x16xf32>
    %c0_247 = arith.constant 0 : index
    %c0_248 = arith.constant 0 : index
    %380 = vector.load %arg10[%c0_247, %c0_248] : memref<2x16xf32, #tpu.memory_space<vmem>>, vector<2x16xf32>
    tpu.vector_store %arg10[%c0_247, %c0_248], %379 {strides = array<i32>} : memref<2x16xf32, #tpu.memory_space<vmem>>, vector<2x16xf32>,
    return
  }
  func.func @transform_0(%arg0: i32) -> (i32, i32, i32) {
    %c0_i32 = arith.constant 0 : i32
    %c0_i32_0 = arith.constant 0 : i32
    %c0_i32_1 = arith.constant 0 : i32
    return %arg0, %c0_i32, %c0_i32_0 : i32, i32, i32
  }
  func.func @transform_1(%arg0: i32) -> (i32, i32, i32) {
    %c0_i32 = arith.constant 0 : i32
    %c0_i32_0 = arith.constant 0 : i32
    %c0_i32_1 = arith.constant 0 : i32
    return %arg0, %c0_i32, %c0_i32_0 : i32, i32, i32
  }
  func.func @transform_2(%arg0: i32) -> (i32, i32) {
    %c0_i32 = arith.constant 0 : i32
    %c0_i32_0 = arith.constant 0 : i32
    %c0_i32_1 = arith.constant 0 : i32
    return %c0_i32, %c0_i32_0 : i32, i32
  }
  func.func @transform_3(%arg0: i32) -> (i32, i32, i32) {
    %c0_i32 = arith.constant 0 : i32
    %c0_i32_0 = arith.constant 0 : i32
    %c0_i32_1 = arith.constant 0 : i32
    %c0_i32_2 = arith.constant 0 : i32
    return %c0_i32, %c0_i32_0, %c0_i32_1 : i32, i32, i32
  }
  func.func @transform_4(%arg0: i32) -> (i32, i32, i32) {
    %c0_i32 = arith.constant 0 : i32
    %c0_i32_0 = arith.constant 0 : i32
    %c0_i32_1 = arith.constant 0 : i32
    %c0_i32_2 = arith.constant 0 : i32
    return %c0_i32, %c0_i32_0, %c0_i32_1 : i32, i32, i32
  }
  func.func @transform_5(%arg0: i32) -> (i32, i32, i32) {
    %c0_i32 = arith.constant 0 : i32
    %c0_i32_0 = arith.constant 0 : i32
    %c0_i32_1 = arith.constant 0 : i32
    %c0_i32_2 = arith.constant 0 : i32
    return %c0_i32, %c0_i32_0, %c0_i32_1 : i32, i32, i32
  }
  func.func @transform_6(%arg0: i32) -> (i32, i32, i32) {
    %c0_i32 = arith.constant 0 : i32
    %c0_i32_0 = arith.constant 0 : i32
    %c0_i32_1 = arith.constant 0 : i32
    %c0_i32_2 = arith.constant 0 : i32
    return %c0_i32, %c0_i32_0, %c0_i32_1 : i32, i32, i32
  }
  func.func @transform_7(%arg0: i32) -> (i32, i32, i32) {
    %c0_i32 = arith.constant 0 : i32
    %c0_i32_0 = arith.constant 0 : i32
    %c0_i32_1 = arith.constant 0 : i32
    %c0_i32_2 = arith.constant 0 : i32
    return %c0_i32, %c0_i32_0, %c0_i32_1 : i32, i32, i32
  }
  func.func @transform_8(%arg0: i32) -> (i32, i32) {
    %c0_i32 = arith.constant 0 : i32
    %c0_i32_0 = arith.constant 0 : i32
    %c0_i32_1 = arith.constant 0 : i32
    return %c0_i32, %c0_i32_0 : i32, i32
  }
  func.func @transform_9(%arg0: i32) -> (i32, i32) {
    %c0_i32 = arith.constant 0 : i32
    %c0_i32_0 = arith.constant 0 : i32
    return %arg0, %c0_i32 : i32, i32
  }
}

</mosaic_0001>

<bundles_post_ra>
// kernel: textnet_forward.1
= control target key start
LH: loop header
LB: loop body
LE: loop exit
PB: predicated region body
PF: predicated region fallthrough
CT: control target
= control target key end

     0   :  { %vm37_vm0 = vcmask 261120   ;;  %s4916_s0 = inlined_call_operand.vmem [shape: f32[2,8,32], index: 0, kind: input, shape index: {}]   ;;  %s4917_s1 = inlined_call_operand.vmem [shape: f32[2,1,8], index: 1, kind: input, shape index: {}]   ;;  %s4918_s2 = inlined_call_operand.vmem [shape: f32[1,80], index: 2, kind: input, shape index: {}]   ;;  %s4919_s3 = inlined_call_operand.vmem [shape: bf16[2,32,96], index: 3, kind: input, shape index: {}]   ;;  %s4920_s4 = inlined_call_operand.vmem [shape: bf16[2,32,32], index: 4, kind: input, shape index: {}]   ;;  %s4921_s5 = inlined_call_operand.vmem [shape: bf16[2,32,64], index: 5, kind: input, shape index: {}]   ;;  %s4922_s6 = inlined_call_operand.vmem [shape: bf16[2,64,32], index: 6, kind: input, shape index: {}]   ;;  %s4923_s7 = inlined_call_operand.vmem [shape: f32[2,1,352], index: 7, kind: input, shape index: {}]   ;;  %s4924_s8 = inlined_call_operand.vmem [shape: bf16[32,16], index: 8, kind: input, shape index: {}]   ;;  %s4925_s9 = inlined_call_operand.hbm [shape: f32[2,16], index: 9, kind: output, shape index: {}]  }
   0x1   :  { %v34_v0 = vld [vmem:[%s4916_s0] sm:$0xff]  ;;  %v35_v1 = vld [vmem:[%s4916_s0 + $0x8] sm:$0xff] }
   0x2   :  { %v38_v2 = vsel %vm37_vm0, %v34_v0, 0.0  ;;  %v41_v3 = vsel %vm37_vm0, %v35_v1, 0.0 }
   0x3   :  { %39 = vadd.xlane.f32.xlu0 %v38_v2 }
   0x7   :  { %42 = vadd.xlane.f32.xlu0 %v41_v3 }
   0x8   :  { %14 = vsyncpa [#allocation5], 0  ;;  %v3683_v4 = vld [vmem:[%s4918_s2] ss:$0 sm:$0xff]  ;;  %s4286_s15 = smov 96   ;;  %v4147_v15 = vld [vmem:[%s4919_s3 + $0x8] sm:$0xff]  }
   0x9   :  { %v4287_v16 = vmov 0.0   ;;  %v4148_v17 = vld [vmem:[%s4919_s3] sm:$0xff]   ;;  %vm4288_vm1 = vmmov 0   ;;  %vm162_vm2 = vcmask 785408   ;;  %vm170_vm3 = vcmask 64512   ;;  %s4289_s25 = smov 64  }
   0xa   :  { %3889 = vmatprep.subr.bf16.mxu0 %v4287_v16  ;;  %3897 = vmatprep.subr.mxu1 %v4287_v16  ;;  %v4394_v34 = vld [vmem:[%s4923_s7] ss:$0 sm:$0xff]  ;;  %v4429_v49 = vld [vmem:[%s4917_s1 + $0x1] ss:$0 sm:$0xff]  ;;  %s4290_s26 = smov 88   ;;  %s4291_s27 = smov 120  }
   0xb   :  { %3890 = vmatpush3.bf16.msra.mxu0 %v4147_v15  ;;  %3893 = vmatprep.mubr.msk.bf16.mxu0 %vm4288_vm1, %v4287_v16  ;;  %v4423_v45 = vld [vmem:[%s4917_s1] ss:$0 sm:$0xff]  ;;  %s4292_s28 = smov 56   ;;  %s4293_s29 = smov 80   ;;  %vm840_vm4 = vcmask 130112   ;;  %vm1185_vm5 = vcmask 195712  }
   0xc   :  { %3891 = vmatprep.subr.bf16.mxu0 %v4287_v16  ;;  %3899 = vmatprep.mubr.msk.f32.mxu1 %vm4288_vm1, %v4287_v16  ;;  %s4294_s30 = smov 112   ;;  %s4295_s10 = smov 48   ;;  %vm1530_vm6 = vcmask 261312   ;;  %vm1761_vm7 = vcmask 523264   ;;  %vm3606_vm8 = vcmask 1041409   ;;  %vm3667_vm9 = vcmask 123904  }
   0xd   :  { %s4296_s11 = smov 72   ;;  %s4297_s12 = smov 104  }
   0xe   :  { %s4298_s13 = smov 40   ;;  %s4299_s14 = smov 8  }
   0xf   :  { %3892 = vmatpush3.bf16.msra.mxu0 %v4148_v17  ;;  %s4300_s0 = smov 16   ;;  %s4301_s20 = smov 24  }
  0x10   :  { %3912 = vmatprep.subr.mxu0 %v4287_v16  ;;  %s4926_s21 = smov 32  }
  0x1d   :  { %73 = vrot.lane.b32.xlu0 %v3683_v4, %s4286_s15 }
  0x8c   :  { %v40_v5 = vpop.xlane.xlu0 %39 }
  0x8d   :  { %v45_v6 = vmul.f32 0.03125, %v40_v5 }
  0x8f   :  { %v47_v7 = vsub.f32 %v34_v0, %v45_v6 }
  0x90   :  { %v43_v8 = vpop.xlane.xlu0 %42 }
  0x91   :  { %v46_v9 = vmul.f32 0.03125, %v43_v8  ;;  %v49_v10 = vmul.f32 %v47_v7, %v47_v7 }
  0x93   :  { %v48_v11 = vsub.f32 %v35_v1, %v46_v9  ;;  %v51_v12 = vsel %vm37_vm0, %v49_v10, 0.0 }
  0x94   :  { %52 = vadd.xlane.f32.xlu1 %v51_v12  ;;  %v74_v29 = vpop.permute.xlu0 %73 }
  0x95   :  { %v50_v13 = vmul.f32 %v48_v11, %v48_v11 }
  0x97   :  { %v54_v14 = vsel %vm37_vm0, %v50_v13, 0.0 }
  0x98   :  { %55 = vadd.xlane.f32.xlu1 %v54_v14 }
 0x11d   :  { %v53_v18 = vpop.xlane.xlu1 %52 }
 0x11e   :  { %v57_v19 = vmul.f32 0.03125, %v53_v18 }
 0x120   :  { %v59_v20 = vadd.f32 1e-12, %v57_v19 }
 0x121   :  { %v56_v21 = vpop.xlane.xlu1 %55 }
 0x122   :  { %4169 = vrsqrt.f32 %v59_v20  ;;  %v58_v22 = vmul.f32 0.03125, %v56_v21 }
 0x124   :  { %v60_v23 = vadd.f32 1e-12, %v58_v22 }
 0x126   :  { %4171 = vrsqrt.f32 %v60_v23 }
 0x12f   :  { %v4170_v24 = vpop.eup %4169 }
 0x130   :  { %v63_v25 = vmul.f32 %v4170_v24, %v47_v7 }
 0x132   :  { %v71_v28 = vmul.f32 %v3683_v4, %v63_v25 }
 0x133   :  { %v4172_v26 = vpop.eup %4171 }
 0x134   :  { %v64_v27 = vmul.f32 %v4172_v26, %v48_v11  ;;  %v4382_v31 = vadd.f32 %v74_v29, %v71_v28 }
 0x136   :  { %v72_v30 = vmul.f32 %v3683_v4, %v64_v27 }
 0x138   :  { %v4384_v32 = vadd.f32 %v74_v29, %v72_v30 }
 0x13a   :  { %v95_v33 = vpack.c.bf16 %v4384_v32, %v4382_v31 }
 0x13c   :  { %3894 = vmatmul.mubr.msk.bf16.vlgmr.msra.gmra.mxu0 %vm37_vm0, %v95_v33 }
 0x13d   :  { %3914 = vmatprep.mubr.msk.f32.mxu0 %vm4288_vm1, %v4287_v16 }
 0x1fc   :  { %v155_v35 = vpop.f32.mrf.mxu0 }
 0x1fd   :  { %v156_v36 = vadd.f32 %v4394_v34, %v155_v35 }
 0x1fe   :  { %v3895_v37 = vpop.f32.mrf.mxu0 }
 0x1ff   :  { %163 = vst.msk [vmem:[#allocation2] sm:$0xff] %vm162_vm2, %v156_v36 }
 0x200   :  { %v158_v38 = vpop.f32.mrf.mxu0 }
 0x201   :  { %v159_v39 = vadd.f32 %v4394_v34, %v158_v38 }
 0x202   :  { %v3896_v40 = vpop.f32.mrf.mxu0 }
 0x203   :  { %164 = vst.msk [vmem:[#allocation2 + $0x8] sm:$0xff] %vm162_vm2, %v159_v39 }
 0x206   :  { %v4400_v41 = vld [vmem:[#allocation2] sm:$0xff] }
 0x207   :  { %168 = vrot.lane.b32.xlu1 %v4400_v41, %s4286_s15 }
 0x20a   :  { %v4404_v42 = vld [vmem:[#allocation2 + $0x8] sm:$0xff] }
 0x20b   :  { %246 = vrot.lane.b32.xlu1 %v4404_v42, %s4286_s15 }
 0x279   :  { %v169_v43 = vpop.permute.xlu1 %168 }
 0x27a   :  { %3898 = vmatpush3.xpose.msk.msra.mxu1 %vm170_vm3, %v169_v43 }
 0x27b   :  { %3902 = vmatprep.subr.mxu1 %v4287_v16 }
 0x27d   :  { %3900 = vmatmul.mubr.msk.f32.vlgmr.msra.gmra.mxu1 %vm170_vm3, %v4400_v41  ;;  %v247_v44 = vpop.permute.xlu1 %246 }
 0x27e   :  { %3903 = vmatpush3.xpose.msk.msra.mxu1 %vm170_vm3, %v247_v44  ;;  %3904 = vmatprep.mubr.msk.f32.mxu1 %vm4288_vm1, %v4287_v16 }
 0x27f   :  { %3907 = vmatprep.subr.mxu1 %v4287_v16 }
 0x281   :  { %3905 = vmatmul.mubr.msk.f32.vlgmr.msra.gmra.mxu1 %vm170_vm3, %v4404_v42 }
 0x282   :  { %3909 = vmatprep.mubr.msk.f32.mxu1 %vm4288_vm1, %v4287_v16 }
 0x33d   :  { %v241_v46 = vpop.f32.mrf.mxu1 }
 0x33e   :  { %v242_v47 = vadd.f32 %v4423_v45, %v241_v46 }
 0x33f   :  { %v3901_v48 = vpop.f32.mrf.mxu1 }
 0x340   :  { %v322_v50 = vsel %vm170_vm3, %v242_v47, -inf }
 0x341   :  { %323 = vmax.xlane.f32.xlu1 %v322_v50  ;;  %v318_v51 = vpop.f32.mrf.mxu1 }
 0x342   :  { %v319_v52 = vadd.f32 %v4429_v49, %v318_v51 }
 0x343   :  { %v3906_v53 = vpop.f32.mrf.mxu1 }
 0x344   :  { %v325_v54 = vsel %vm170_vm3, %v319_v52, -inf }
 0x345   :  { %326 = vmax.xlane.f32.xlu0 %v325_v54 }
 0x352   :  { %344 = vrot.lane.b32.xlu1 %v4400_v41, %s4289_s25 }
 0x356   :  { %503 = vrot.lane.b32.xlu1 %v4400_v41, %s4290_s26 }
 0x35a   :  { %582 = vrot.lane.b32.xlu1 %v4404_v42, %s4290_s26 }
 0x35e   :  { %501 = vrot.lane.b32.xlu1 %v4400_v41, %s4291_s27 }
 0x3ca   :  { %v324_v55 = vpop.xlane.xlu1 %323 }
 0x3cb   :  { %v328_v56 = vsub.f32 %v242_v47, %v324_v55 }
 0x3cd   :  { %v330_v57 = vmul.f32 1.442695, %v328_v56 }
 0x3ce   :  { %v327_v58 = vpop.xlane.xlu0 %326  ;;  %v345_v59 = vpop.permute.xlu1 %344 }
 0x3cf   :  { %4173 = vpow2.f32 %v330_v57  ;;  %v329_v60 = vsub.f32 %v319_v52, %v327_v58  ;;  %3908 = vmatpush3.msra.mxu1 %v345_v59 }
 0x3d0   :  { %3917 = vmatprep.subr.mxu1 %v4287_v16 }
 0x3d1   :  { %v332_v61 = vmul.f32 1.442695, %v329_v60 }
 0x3d2   :  { %v504_v4 = vpop.permute.xlu1 %503 }
 0x3d3   :  { %4175 = vpow2.f32 %v332_v61 }
 0x3d6   :  { %v583_v7 = vpop.permute.xlu1 %582 }
 0x3da   :  { %v502_v11 = vpop.permute.xlu1 %501 }
 0x3dc   :  { %v4174_v62 = vpop.eup %4173 }
 0x3dd   :  { %v334_v63 = vsel %vm170_vm3, %v4174_v62, 0.0 }
 0x3de   :  { %335 = vadd.xlane.f32.xlu0 %v334_v63 }
 0x3e0   :  { %v4176_v0 = vpop.eup %4175 }
 0x3e1   :  { %v337_v1 = vsel %vm170_vm3, %v4176_v0, 0.0 }
 0x3e2   :  { %338 = vadd.xlane.f32.xlu0 %v337_v1 }
 0x3f8   :  { %420 = vrot.lane.b32.xlu0 %v4404_v42, %s4289_s25 }
 0x3fc   :  { %580 = vrot.lane.b32.xlu0 %v4404_v42, %s4291_s27 }
 0x467   :  { %v336_v2 = vpop.xlane.xlu0 %335 }
 0x468   :  { %4177 = vrcp.f32 %v336_v2 }
 0x46b   :  { %v339_v3 = vpop.xlane.xlu0 %338 }
 0x46c   :  { %4179 = vrcp.f32 %v339_v3 }
 0x46f   :  { %v421_v5 = vpop.permute.xlu0 %420 }
 0x470   :  { %3913 = vmatpush3.msra.mxu0 %v421_v5 }
 0x471   :  { %3922 = vmatprep.subr.mxu0 %v4287_v16 }
 0x473   :  { %v581_v12 = vpop.permute.xlu0 %580 }
 0x475   :  { %v4178_v6 = vpop.eup %4177 }
 0x476   :  { %v342_v8 = vmul.f32 %v4178_v6, %v4174_v62 }
 0x478   :  { %3910 = vmatmul.mubr.msk.f32.vlgmr.msra.gmra.mxu1 %vm170_vm3, %v342_v8 }
 0x479   :  { %v4180_v9 = vpop.eup %4179  ;;  %3918 = vmatpush3.xpose.msk.msra.mxu1 %vm170_vm3, %v504_v4  ;;  %3919 = vmatprep.mubr.msk.f32.mxu1 %vm4288_vm1, %v4287_v16 }
 0x47a   :  { %v343_v10 = vmul.f32 %v4180_v9, %v4176_v0  ;;  %3927 = vmatprep.subr.mxu1 %v4287_v16 }
 0x47c   :  { %3915 = vmatmul.mubr.msk.f32.vlgmr.msra.gmra.mxu0 %vm170_vm3, %v343_v10  ;;  %3920 = vmatmul.mubr.msk.f32.vlgmr.msra.gmra.mxu1 %vm170_vm3, %v502_v11 }
 0x47d   :  { %3923 = vmatpush3.xpose.msk.msra.mxu0 %vm170_vm3, %v583_v7  ;;  %3924 = vmatprep.mubr.msk.f32.mxu0 %vm4288_vm1, %v4287_v16 }
 0x47e   :  { %3932 = vmatprep.subr.mxu0 %v4287_v16  ;;  %3929 = vmatprep.mubr.msk.f32.mxu1 %vm4288_vm1, %v4287_v16 }
 0x480   :  { %3925 = vmatmul.mubr.msk.f32.vlgmr.msra.gmra.mxu0 %vm170_vm3, %v581_v12 }
 0x481   :  { %3934 = vmatprep.mubr.msk.f32.mxu0 %vm4288_vm1, %v4287_v16 }
 0x538   :  { %v416_v13 = vpop.f32.mrf.mxu1 }
 0x539   :  { %496 = vst.msk [vmem:[#allocation3] sm:$0xff] %vm170_vm3, %v416_v13 }
 0x53a   :  { %v3911_v14 = vpop.f32.mrf.mxu1 }
 0x53c   :  { %v492_v15 = vpop.f32.mrf.mxu0  ;;  %v575_v17 = vpop.f32.mrf.mxu1 }
 0x53d   :  { %497 = vst.msk [vmem:[#allocation3 + $0x8] sm:$0xff] %vm170_vm3, %v492_v15  ;;  %v576_v18 = vadd.f32 %v4423_v45, %v575_v17 }
 0x53e   :  { %v3916_v19 = vpop.f32.mrf.mxu0  ;;  %v3921_v20 = vpop.f32.mrf.mxu1 }
 0x53f   :  { %v658_v21 = vsel %vm170_vm3, %v576_v18, -inf }
 0x540   :  { %659 = vmax.xlane.f32.xlu1 %v658_v21  ;;  %v654_v22 = vpop.f32.mrf.mxu0 }
 0x541   :  { %v655_v23 = vadd.f32 %v4429_v49, %v654_v22 }
 0x542   :  { %v3926_v24 = vpop.f32.mrf.mxu0 }
 0x543   :  { %v661_v25 = vsel %vm170_vm3, %v655_v23, -inf }
 0x544   :  { %662 = vmax.xlane.f32.xlu0 %v661_v25 }
 0x551   :  { %680 = vrot.lane.b32.xlu1 %v4400_v41, %s4292_s28 }
 0x555   :  { %848 = vrot.lane.b32.xlu1 %v4400_v41, %s4293_s29 }
 0x559   :  { %927 = vrot.lane.b32.xlu1 %v4404_v42, %s4293_s29 }
 0x55d   :  { %846 = vrot.lane.b32.xlu1 %v4400_v41, %s4294_s30 }
 0x5c9   :  { %v660_v26 = vpop.xlane.xlu1 %659 }
 0x5ca   :  { %v664_v27 = vsub.f32 %v576_v18, %v660_v26 }
 0x5cc   :  { %v666_v28 = vmul.f32 1.442695, %v664_v27 }
 0x5cd   :  { %v681_v29 = vpop.permute.xlu1 %680  ;;  %v663_v30 = vpop.xlane.xlu0 %662 }
 0x5ce   :  { %4181 = vpow2.f32 %v666_v28  ;;  %v665_v33 = vsub.f32 %v655_v23, %v663_v30  ;;  %3928 = vmatpush3.msra.mxu1 %v681_v29 }
 0x5cf   :  { %3937 = vmatprep.subr.mxu1 %v4287_v16 }
 0x5d0   :  { %v668_v35 = vmul.f32 1.442695, %v665_v33 }
 0x5d1   :  { %v849_v44 = vpop.permute.xlu1 %848 }
 0x5d2   :  { %4183 = vpow2.f32 %v668_v35 }
 0x5d5   :  { %v928_v48 = vpop.permute.xlu1 %927 }
 0x5d9   :  { %v847_v53 = vpop.permute.xlu1 %846 }
 0x5db   :  { %v4182_v36 = vpop.eup %4181 }
 0x5dc   :  { %v670_v37 = vsel %vm170_vm3, %v4182_v36, 0.0 }
 0x5dd   :  { %671 = vadd.xlane.f32.xlu0 %v670_v37 }
 0x5df   :  { %v4184_v38 = vpop.eup %4183 }
 0x5e0   :  { %v673_v39 = vsel %vm170_vm3, %v4184_v38, 0.0 }
 0x5e1   :  { %674 = vadd.xlane.f32.xlu0 %v673_v39 }
 0x5f7   :  { %756 = vrot.lane.b32.xlu0 %v4404_v42, %s4292_s28 }
 0x5fb   :  { %925 = vrot.lane.b32.xlu0 %v4404_v42, %s4294_s30 }
 0x666   :  { %v672_v40 = vpop.xlane.xlu0 %671 }
 0x667   :  { %4185 = vrcp.f32 %v672_v40 }
 0x66a   :  { %v675_v43 = vpop.xlane.xlu0 %674 }
 0x66b   :  { %4187 = vrcp.f32 %v675_v43 }
 0x66e   :  { %v757_v46 = vpop.permute.xlu0 %756 }
 0x66f   :  { %3933 = vmatpush3.msra.mxu0 %v757_v46 }
 0x670   :  { %3942 = vmatprep.subr.mxu0 %v4287_v16 }
 0x672   :  { %v926_v54 = vpop.permute.xlu0 %925 }
 0x674   :  { %v4186_v47 = vpop.eup %4185 }
 0x675   :  { %v678_v50 = vmul.f32 %v4186_v47, %v4182_v36 }
 0x677   :  { %3930 = vmatmul.mubr.msk.f32.vlgmr.msra.gmra.mxu1 %vm170_vm3, %v678_v50 }
 0x678   :  { %v4188_v51 = vpop.eup %4187  ;;  %3938 = vmatpush3.xpose.msk.msra.mxu1 %vm170_vm3, %v849_v44  ;;  %3939 = vmatprep.mubr.msk.f32.mxu1 %vm4288_vm1, %v4287_v16 }
 0x679   :  { %v679_v52 = vmul.f32 %v4188_v51, %v4184_v38  ;;  %3947 = vmatprep.subr.mxu1 %v4287_v16 }
 0x67b   :  { %3935 = vmatmul.mubr.msk.f32.vlgmr.msra.gmra.mxu0 %vm170_vm3, %v679_v52  ;;  %3940 = vmatmul.mubr.msk.f32.vlgmr.msra.gmra.mxu1 %vm170_vm3, %v847_v53 }
 0x67c   :  { %3943 = vmatpush3.xpose.msk.msra.mxu0 %vm170_vm3, %v928_v48  ;;  %3944 = vmatprep.mubr.msk.f32.mxu0 %vm4288_vm1, %v4287_v16 }
 0x67d   :  { %3952 = vmatprep.subr.mxu0 %v4287_v16  ;;  %3949 = vmatprep.mubr.msk.f32.mxu1 %vm4288_vm1, %v4287_v16 }
 0x67f   :  { %3945 = vmatmul.mubr.msk.f32.vlgmr.msra.gmra.mxu0 %vm170_vm3, %v926_v54 }
 0x680   :  { %3954 = vmatprep.mubr.msk.f32.mxu0 %vm4288_vm1, %v4287_v16 }
 0x737   :  { %v4504_v55 = vpop.f32.mrf.mxu1 }
 0x739   :  { %v3931_v56 = vpop.f32.mrf.mxu1 }
 0x73b   :  { %v4506_v57 = vpop.f32.mrf.mxu0  ;;  %v920_v58 = vpop.f32.mrf.mxu1 }
 0x73c   :  { %v921_v59 = vadd.f32 %v4423_v45, %v920_v58 }
 0x73d   :  { %v3936_v60 = vpop.f32.mrf.mxu0  ;;  %v3941_v61 = vpop.f32.mrf.mxu1 }
 0x73e   :  { %v1003_v62 = vsel %vm170_vm3, %v921_v59, -inf }
 0x73f   :  { %1004 = vmax.xlane.f32.xlu1 %v1003_v62  ;;  %v999_v63 = vpop.f32.mrf.mxu0 }
 0x740   :  { %v1000_v0 = vadd.f32 %v4429_v49, %v999_v63 }
 0x741   :  { %v3946_v1 = vpop.f32.mrf.mxu0 }
 0x742   :  { %v1006_v2 = vsel %vm170_vm3, %v1000_v0, -inf  ;;  %v4149_v1 = vld [vmem:[%s4920_s4 + $0x8] sm:$0xff]  }
 0x743   :  { %1007 = vmax.xlane.f32.xlu0 %v1006_v2  ;;  %v4150_v2 = vld [vmem:[%s4920_s4] sm:$0xff]  }
 0x750   :  { %1025 = vrot.lane.b32.xlu1 %v4400_v41, %s4295_s10 }
 0x754   :  { %1193 = vrot.lane.b32.xlu1 %v4400_v41, %s4296_s11 }
 0x758   :  { %1272 = vrot.lane.b32.xlu1 %v4404_v42, %s4296_s11 }
 0x75c   :  { %1191 = vrot.lane.b32.xlu1 %v4400_v41, %s4297_s12 }
 0x7c8   :  { %v1005_v3 = vpop.xlane.xlu1 %1004 }
 0x7c9   :  { %v1009_v4 = vsub.f32 %v921_v59, %v1005_v3 }
 0x7cb   :  { %v1011_v5 = vmul.f32 1.442695, %v1009_v4 }
 0x7cc   :  { %v1026_v6 = vpop.permute.xlu1 %1025  ;;  %v1008_v7 = vpop.xlane.xlu0 %1007 }
 0x7cd   :  { %4189 = vpow2.f32 %v1011_v5  ;;  %v1010_v8 = vsub.f32 %v1000_v0, %v1008_v7  ;;  %3948 = vmatpush3.msra.mxu1 %v1026_v6 }
 0x7ce   :  { %3957 = vmatprep.subr.mxu1 %v4287_v16 }
 0x7cf   :  { %v1013_v9 = vmul.f32 1.442695, %v1010_v8 }
 0x7d0   :  { %v1194_v17 = vpop.permute.xlu1 %1193 }
 0x7d1   :  { %4191 = vpow2.f32 %v1013_v9 }
 0x7d4   :  { %v1273_v20 = vpop.permute.xlu1 %1272 }
 0x7d8   :  { %v1192_v24 = vpop.permute.xlu1 %1191 }
 0x7da   :  { %v4190_v10 = vpop.eup %4189 }
 0x7db   :  { %v1015_v11 = vsel %vm170_vm3, %v4190_v10, 0.0 }
 0x7dc   :  { %1016 = vadd.xlane.f32.xlu0 %v1015_v11 }
 0x7de   :  { %v4192_v12 = vpop.eup %4191 }
 0x7df   :  { %v1018_v13 = vsel %vm170_vm3, %v4192_v12, 0.0 }
 0x7e0   :  { %1019 = vadd.xlane.f32.xlu0 %v1018_v13 }
 0x7f6   :  { %1101 = vrot.lane.b32.xlu0 %v4404_v42, %s4295_s10 }
 0x7fa   :  { %1270 = vrot.lane.b32.xlu0 %v4404_v42, %s4297_s12 }
 0x865   :  { %v1017_v14 = vpop.xlane.xlu0 %1016 }
 0x866   :  { %4193 = vrcp.f32 %v1017_v14 }
 0x869   :  { %v1020_v15 = vpop.xlane.xlu0 %1019 }
 0x86a   :  { %4195 = vrcp.f32 %v1020_v15 }
 0x86d   :  { %v1102_v18 = vpop.permute.xlu0 %1101 }
 0x86e   :  { %3953 = vmatpush3.msra.mxu0 %v1102_v18 }
 0x86f   :  { %3962 = vmatprep.subr.mxu0 %v4287_v16 }
 0x871   :  { %v1271_v25 = vpop.permute.xlu0 %1270 }
 0x873   :  { %v4194_v19 = vpop.eup %4193 }
 0x874   :  { %v1023_v21 = vmul.f32 %v4194_v19, %v4190_v10 }
 0x876   :  { %3950 = vmatmul.mubr.msk.f32.vlgmr.msra.gmra.mxu1 %vm170_vm3, %v1023_v21 }
 0x877   :  { %v4196_v22 = vpop.eup %4195  ;;  %3958 = vmatpush3.xpose.msk.msra.mxu1 %vm170_vm3, %v1194_v17  ;;  %3959 = vmatprep.mubr.msk.f32.mxu1 %vm4288_vm1, %v4287_v16 }
 0x878   :  { %v1024_v23 = vmul.f32 %v4196_v22, %v4192_v12  ;;  %3967 = vmatprep.subr.mxu1 %v4287_v16 }
 0x87a   :  { %3955 = vmatmul.mubr.msk.f32.vlgmr.msra.gmra.mxu0 %vm170_vm3, %v1024_v23  ;;  %3960 = vmatmul.mubr.msk.f32.vlgmr.msra.gmra.mxu1 %vm170_vm3, %v1192_v24  ;;  %v3717_v23 = vld [vmem:[%s4923_s7 + $0x1] ss:$0 sm:$0xff] }
 0x87b   :  { %3963 = vmatpush3.xpose.msk.msra.mxu0 %vm170_vm3, %v1273_v20  ;;  %3964 = vmatprep.mubr.msk.f32.mxu0 %vm4288_vm1, %v4287_v16 }
 0x87c   :  { %3972 = vmatprep.subr.mxu0 %v4287_v16  ;;  %3969 = vmatprep.mubr.msk.f32.mxu1 %vm4288_vm1, %v4287_v16 }
 0x87e   :  { %3965 = vmatmul.mubr.msk.f32.vlgmr.msra.gmra.mxu0 %vm170_vm3, %v1271_v25 }
 0x87f   :  { %3974 = vmatprep.mubr.msk.f32.mxu0 %vm4288_vm1, %v4287_v16 }
 0x936   :  { %v1097_v26 = vpop.f32.mrf.mxu1 }
 0x938   :  { %v3951_v27 = vpop.f32.mrf.mxu1 }
 0x93a   :  { %v1173_v28 = vpop.f32.mrf.mxu0  ;;  %v1265_v29 = vpop.f32.mrf.mxu1 }
 0x93b   :  { %v1266_v30 = vadd.f32 %v4423_v45, %v1265_v29 }
 0x93c   :  { %v3956_v33 = vpop.f32.mrf.mxu0  ;;  %v3961_v35 = vpop.f32.mrf.mxu1 }
 0x93d   :  { %v1348_v36 = vsel %vm170_vm3, %v1266_v30, -inf  ;;  %v4151_v35 = vld [vmem:[%s4921_s5 + $0x8] sm:$0xff]  }
 0x93e   :  { %1349 = vmax.xlane.f32.xlu1 %v1348_v36  ;;  %v1344_v37 = vpop.f32.mrf.mxu0  ;;  %v4152_v36 = vld [vmem:[%s4921_s5] sm:$0xff]  }
 0x93f   :  { %v1345_v38 = vadd.f32 %v4429_v49, %v1344_v37 }
 0x940   :  { %v3966_v39 = vpop.f32.mrf.mxu0 }
 0x941   :  { %v1351_v40 = vsel %vm170_vm3, %v1345_v38, -inf }
 0x942   :  { %1352 = vmax.xlane.f32.xlu0 %v1351_v40 }
 0x94f   :  { %1370 = vrot.lane.b32.xlu1 %v4400_v41, %s4298_s13 }
 0x953   :  { %834 = vrot.lane.b32.xlu1 %v4504_v55, %s4299_s14 }
 0x957   :  { %836 = vrot.lane.b32.xlu1 %v4506_v57, %s4299_s14 }
 0x95b   :  { %1179 = vrot.lane.b32.xlu1 %v1097_v26, %s4300_s0 }
 0x9c7   :  { %v1350_v43 = vpop.xlane.xlu1 %1349 }
 0x9c8   :  { %v1354_v44 = vsub.f32 %v1266_v30, %v1350_v43 }
 0x9ca   :  { %v1356_v46 = vmul.f32 1.442695, %v1354_v44 }
 0x9cb   :  { %v1371_v47 = vpop.permute.xlu1 %1370  ;;  %v1353_v48 = vpop.xlane.xlu0 %1352 }
 0x9cc   :  { %4197 = vpow2.f32 %v1356_v46  ;;  %v1355_v50 = vsub.f32 %v1345_v38, %v1353_v48  ;;  %3968 = vmatpush3.msra.mxu1 %v1371_v47 }
 0x9cd   :  { %3977 = vmatprep.subr.bf16.mxu1 %v4287_v16 }
 0x9ce   :  { %v1358_v41 = vmul.f32 1.442695, %v1355_v50 }
 0x9cf   :  { %v835_v51 = vpop.permute.xlu1 %834 }
 0x9d0   :  { %4199 = vpow2.f32 %v1358_v41  ;;  %841 = vst.msk [vmem:[#allocation3] sm:$0xff] %vm840_vm4, %v835_v51 }
 0x9d3   :  { %v837_v52 = vpop.permute.xlu1 %836 }
 0x9d4   :  { %842 = vst.msk [vmem:[#allocation3 + $0x8] sm:$0xff] %vm840_vm4, %v837_v52 }
 0x9d7   :  { %v1180_v53 = vpop.permute.xlu1 %1179 }
 0x9d8   :  { %1186 = vst.msk [vmem:[#allocation3] sm:$0xff] %vm1185_vm5, %v1180_v53 }
 0x9d9   :  { %v4198_v54 = vpop.eup %4197 }
 0x9da   :  { %v1360_v55 = vsel %vm170_vm3, %v4198_v54, 0.0 }
 0x9db   :  { %1361 = vadd.xlane.f32.xlu0 %v1360_v55 }
 0x9dd   :  { %v4200_v56 = vpop.eup %4199 }
 0x9de   :  { %v1363_v57 = vsel %vm170_vm3, %v4200_v56, 0.0 }
 0x9df   :  { %1364 = vadd.xlane.f32.xlu0 %v1363_v57  ;;  %v4154_v57 = vld [vmem:[%s4922_s6 + $0x10] sm:$0xff]  }
 0x9f5   :  { %1446 = vrot.lane.b32.xlu0 %v4404_v42, %s4298_s13 }
 0x9f9   :  { %1181 = vrot.lane.b32.xlu0 %v1173_v28, %s4300_s0 }
 0xa64   :  { %v1362_v58 = vpop.xlane.xlu0 %1361 }
 0xa65   :  { %4201 = vrcp.f32 %v1362_v58  ;;  %v4155_v58 = vld [vmem:[%s4922_s6 + $0x8] sm:$0xff]  }
 0xa68   :  { %v1365_v59 = vpop.xlane.xlu0 %1364 }
 0xa69   :  { %4203 = vrcp.f32 %v1365_v59  ;;  %v4156_v59 = vld [vmem:[%s4922_s6] sm:$0xff]  }
 0xa6c   :  { %v1447_v60 = vpop.permute.xlu0 %1446 }
 0xa6d   :  { %3973 = vmatpush3.msra.mxu0 %v1447_v60 }
 0xa6e   :  { %3985 = vmatprep.subr.bf16.mxu0 %v4287_v16 }
 0xa70   :  { %v1182_v61 = vpop.permute.xlu0 %1181 }
 0xa71   :  { %1187 = vst.msk [vmem:[#allocation3 + $0x8] sm:$0xff] %vm1185_vm5, %v1182_v61 }
 0xa72   :  { %v4202_v62 = vpop.eup %4201 }
 0xa73   :  { %v1368_v63 = vmul.f32 %v4202_v62, %v4198_v54 }
 0xa75   :  { %3970 = vmatmul.mubr.msk.f32.vlgmr.msra.gmra.mxu1 %vm170_vm3, %v1368_v63 }
 0xa76   :  { %v4204_v0 = vpop.eup %4203  ;;  %3981 = vmatprep.mubr.msk.bf16.mxu1 %vm4288_vm1, %v4287_v16  ;;  %3978 = vmatpush3.bf16.msra.mxu1 %v4149_v1 }
 0xa77   :  { %v1369_v42 = vmul.f32 %v4204_v0, %v4200_v56  ;;  %3979 = vmatprep.subr.bf16.mxu1 %v4287_v16  ;;  %v4153_v56 = vld [vmem:[%s4922_s6 + $0x18] sm:$0xff]  }
 0xa79   :  { %3975 = vmatmul.mubr.msk.f32.vlgmr.msra.gmra.mxu0 %vm170_vm3, %v1369_v42 }
 0xa7a   :  { %3989 = vmatprep.mubr.msk.bf16.mxu0 %vm4288_vm1, %v4287_v16  ;;  %3980 = vmatpush3.bf16.msra.mxu1 %v4150_v2 }
 0xa7b   :  { %3993 = vmatprep.subr.bf16.mxu1 %v4287_v16  ;;  %3986 = vmatpush3.bf16.msra.mxu0 %v4151_v35 }
 0xa7c   :  { %3987 = vmatprep.subr.bf16.mxu0 %v4287_v16 }
 0xa7f   :  { %3988 = vmatpush3.bf16.msra.mxu0 %v4152_v36 }
 0xa80   :  { %4005 = vmatprep.subr.bf16.mxu0 %v4287_v16 }
 0xb35   :  { %v1442_v3 = vpop.f32.mrf.mxu1 }
 0xb36   :  { %1524 = vrot.lane.b32.xlu1 %v1442_v3, %s4301_s20 }
 0xb37   :  { %v3971_v4 = vpop.f32.mrf.mxu1 }
 0xb39   :  { %v1518_v5 = vpop.f32.mrf.mxu0 }
 0xb3a   :  { %1526 = vrot.lane.b32.xlu0 %v1518_v5, %s4301_s20  ;;  %1552 = vrot.lane.b32.xlu1 %v4394_v34, %s4926_s21 }
 0xb3b   :  { %v3976_v6 = vpop.f32.mrf.mxu0 }
 0xba8   :  { %v1525_v7 = vpop.permute.xlu1 %1524 }
 0xba9   :  { %1531 = vst.msk [vmem:[#allocation3] sm:$0xff] %vm1530_vm6, %v1525_v7 }
 0xbac   :  { %v1527_v8 = vpop.permute.xlu0 %1526  ;;  %v1553_v12 = vpop.permute.xlu1 %1552 }
 0xbad   :  { %1532 = vst.msk [vmem:[#allocation3 + $0x8] sm:$0xff] %vm1530_vm6, %v1527_v8 }
 0xbb0   :  { %v1533_v9 = vld [vmem:[#allocation3] sm:$0xff] }
 0xbb4   :  { %v1534_v10 = vld [vmem:[#allocation3 + $0x8] sm:$0xff] }
 0xbb5   :  { %v1535_v11 = vpack.c.bf16 %v1534_v10, %v1533_v9 }
 0xbb7   :  { %3982 = vmatmul.mubr.msk.bf16.vlgmr.msra.gmra.mxu1 %vm37_vm0, %v1535_v11 }
 0xbb8   :  { %4001 = vmatprep.mubr.msk.bf16.mxu1 %vm4288_vm1, %v4287_v16  ;;  %3994 = vmatpush3.bf16.msra.mxu1 %v4153_v56 }
 0xbb9   :  { %3995 = vmatprep.subr.bf16.mxu1 %v4287_v16 }
 0xbbc   :  { %3996 = vmatpush3.bf16.msra.mxu1 %v4154_v57 }
 0xbbd   :  { %3997 = vmatprep.subr.bf16.mxu1 %v4287_v16 }
 0xbc0   :  { %3998 = vmatpush3.bf16.msra.mxu1 %v4155_v58 }
 0xbc1   :  { %3999 = vmatprep.subr.bf16.mxu1 %v4287_v16 }
 0xbc4   :  { %4000 = vmatpush3.bf16.msra.mxu1 %v4156_v59 }
 0xbc5   :  { %4023 = vmatprep.subr.mxu1 %v4287_v16 }
 0xc77   :  { %v1592_v13 = vpop.f32.mrf.mxu1 }
 0xc78   :  { %v1593_v14 = vadd.f32 %v1592_v13, %v1553_v12 }
 0xc79   :  { %v3983_v34 = vpop.f32.mrf.mxu1 }
 0xc7a   :  { %v1599_v15 = vadd.f32 %v1593_v14, %v4382_v31 }
 0xc7b   :  { %v1595_v17 = vpop.f32.mrf.mxu1 }
 0xc7c   :  { %v1596_v18 = vadd.f32 %v1595_v17, %v1553_v12  ;;  %v1601_v19 = vsel %vm37_vm0, %v1599_v15, 0.0 }
 0xc7d   :  { %1602 = vadd.xlane.f32.xlu0 %v1601_v19  ;;  %v3984_v20 = vpop.f32.mrf.mxu1 }
 0xc7e   :  { %v1600_v21 = vadd.f32 %v1596_v18, %v4384_v32 }
 0xc80   :  { %v1604_v22 = vsel %vm37_vm0, %v1600_v21, 0.0 }
 0xc81   :  { %1605 = vadd.xlane.f32.xlu1 %v1604_v22 }
 0xc92   :  { %1657 = vrot.lane.b32.xlu1 %v3717_v23, %s4289_s25 }
 0xd06   :  { %v1603_v24 = vpop.xlane.xlu0 %1602 }
 0xd07   :  { %v1607_v25 = vmul.f32 0.03125, %v1603_v24 }
 0xd09   :  { %v1609_v31 = vsub.f32 %v1599_v15, %v1607_v25 }
 0xd0a   :  { %v1606_v26 = vpop.xlane.xlu1 %1605 }
 0xd0b   :  { %v1608_v27 = vmul.f32 0.03125, %v1606_v26  ;;  %v1611_v28 = vmul.f32 %v1609_v31, %v1609_v31 }
 0xd0d   :  { %v1610_v29 = vsub.f32 %v1600_v21, %v1608_v27  ;;  %v1613_v30 = vsel %vm37_vm0, %v1611_v28, 0.0  ;;  %v3721_v21 = vld [vmem:[%s4923_s7 + $0x2] ss:$0 sm:$0xff] }
 0xd0e   :  { %1614 = vadd.xlane.f32.xlu0 %v1613_v30  ;;  %v1658_v60 = vpop.permute.xlu1 %1657 }
 0xd0f   :  { %v1612_v32 = vmul.f32 %v1610_v29, %v1610_v29 }
 0xd11   :  { %v1616_v33 = vsel %vm37_vm0, %v1612_v32, 0.0 }
 0xd12   :  { %1617 = vadd.xlane.f32.xlu0 %v1616_v33 }
 0xd28   :  { %1635 = vrot.lane.b32.xlu0 %v3717_v23, %s4286_s15 }
 0xd97   :  { %v1615_v37 = vpop.xlane.xlu0 %1614 }
 0xd98   :  { %v1619_v38 = vmul.f32 0.03125, %v1615_v37 }
 0xd9a   :  { %v1621_v39 = vadd.f32 1e-12, %v1619_v38 }
 0xd9b   :  { %v1618_v40 = vpop.xlane.xlu0 %1617 }
 0xd9c   :  { %4205 = vrsqrt.f32 %v1621_v39  ;;  %v1620_v43 = vmul.f32 0.03125, %v1618_v40 }
 0xd9e   :  { %v1622_v44 = vadd.f32 1e-12, %v1620_v43 }
 0xd9f   :  { %v1636_v51 = vpop.permute.xlu0 %1635 }
 0xda0   :  { %4207 = vrsqrt.f32 %v1622_v44 }
 0xda9   :  { %v4206_v46 = vpop.eup %4205 }
 0xdaa   :  { %v1625_v47 = vmul.f32 %v4206_v46, %v1609_v31  ;;  %v4157_v46 = vld [vmem:[%s4919_s3 + $0x18] sm:$0xff]  }
 0xdac   :  { %v1633_v41 = vmul.f32 %v3717_v23, %v1625_v47  ;;  %v4158_v47 = vld [vmem:[%s4919_s3 + $0x10] sm:$0xff]  }
 0xdad   :  { %v4208_v48 = vpop.eup %4207 }
 0xdae   :  { %v1626_v50 = vmul.f32 %v4208_v48, %v1610_v29  ;;  %v1638_v53 = vadd.f32 %v1636_v51, %v1633_v41 }
 0xdb0   :  { %v1634_v52 = vmul.f32 %v3717_v23, %v1626_v50 }
 0xdb2   :  { %v1639_v54 = vadd.f32 %v1636_v51, %v1634_v52 }
 0xdb4   :  { %v1640_v55 = vpack.c.bf16 %v1639_v54, %v1638_v53 }
 0xdb6   :  { %3990 = vmatmul.mubr.msk.bf16.vlgmr.msra.gmra.mxu0 %vm37_vm0, %v1640_v55 }
 0xdb7   :  { %4009 = vmatprep.mubr.msk.bf16.mxu0 %vm4288_vm1, %v4287_v16  ;;  %4006 = vmatpush3.bf16.msra.mxu0 %v4157_v46 }
 0xdb8   :  { %4007 = vmatprep.subr.bf16.mxu0 %v4287_v16 }
 0xdbb   :  { %4008 = vmatpush3.bf16.msra.mxu0 %v4158_v47  ;;  %v4726_v47 = vld [vmem:[%s4917_s1] ss:$0 sm:$0xff] }
 0xdbc   :  { %4013 = vmatprep.subr.mxu0 %v4287_v16 }
 0xe76   :  { %v1697_v61 = vpop.f32.mrf.mxu0 }
 0xe77   :  { %v1698_v62 = vadd.f32 %v1697_v61, %v1658_v60 }
 0xe78   :  { %v3991_v63 = vpop.f32.mrf.mxu0 }
 0xe79   :  { %v1706_v0 = vmul.f32 0.044715, %v1698_v62  ;;  %v1704_v34 = vmul.f32 0.5, %v1698_v62 }
 0xe7a   :  { %v1700_v42 = vpop.f32.mrf.mxu0 }
 0xe7b   :  { %v1708_v1 = vmul.f32 %v1706_v0, %v1698_v62  ;;  %v1701_v2 = vadd.f32 %v1700_v42, %v1658_v60  ;;  %v4659_v42 = vld [vmem:[%s4923_s7 + $0x3] ss:$0 sm:$0xff] }
 0xe7c   :  { %v3992_v3 = vpop.f32.mrf.mxu0 }
 0xe7d   :  { %v1710_v4 = vmul.f32 %v1708_v1, %v1698_v62  ;;  %v1707_v5 = vmul.f32 0.044715, %v1701_v2  ;;  %v1705_v15 = vmul.f32 0.5, %v1701_v2 }
 0xe7f   :  { %v1712_v6 = vadd.f32 %v1710_v4, %v1698_v62  ;;  %v1709_v7 = vmul.f32 %v1707_v5, %v1701_v2 }
 0xe81   :  { %v1714_v8 = vmul.f32 0.7978846, %v1712_v6  ;;  %v1711_v9 = vmul.f32 %v1709_v7, %v1701_v2 }
 0xe83   :  { %4209 = vtanh.f32 %v1714_v8  ;;  %v1713_v10 = vadd.f32 %v1711_v9, %v1701_v2 }
 0xe85   :  { %v1715_v11 = vmul.f32 0.7978846, %v1713_v10 }
 0xe87   :  { %4211 = vtanh.f32 %v1715_v11 }
 0xe90   :  { %v4210_v12 = vpop.eup %4209 }
 0xe91   :  { %v1718_v13 = vadd.f32 1.0, %v4210_v12 }
 0xe93   :  { %v1720_v18 = vmul.f32 %v1718_v13, %v1704_v34 }
 0xe94   :  { %v4212_v14 = vpop.eup %4211 }
 0xe95   :  { %v1719_v17 = vadd.f32 1.0, %v4212_v14 }
 0xe97   :  { %v1721_v19 = vmul.f32 %v1719_v17, %v1705_v15 }
 0xe99   :  { %v1722_v20 = vpack.c.bf16 %v1721_v19, %v1720_v18 }
 0xe9b   :  { %4002 = vmatmul.mubr.msk.bf16.vlgmr.msra.gmra.mxu1 %vm1761_vm7, %v1722_v20 }
 0xe9c   :  { %4025 = vmatprep.mubr.msk.f32.mxu1 %vm4288_vm1, %v4287_v16 }
 0xf5b   :  { %v1799_v22 = vpop.f32.mrf.mxu1 }
 0xf5c   :  { %v1800_v23 = vadd.f32 %v3721_v21, %v1799_v22 }
 0xf5d   :  { %v4003_v24 = vpop.f32.mrf.mxu1 }
 0xf5e   :  { %v1806_v25 = vadd.f32 %v1800_v23, %v1638_v53 }
 0xf5f   :  { %v1802_v31 = vpop.f32.mrf.mxu1 }
 0xf60   :  { %v1803_v26 = vadd.f32 %v3721_v21, %v1802_v31  ;;  %v1808_v27 = vsel %vm37_vm0, %v1806_v25, 0.0 }
 0xf61   :  { %1809 = vadd.xlane.f32.xlu1 %v1808_v27  ;;  %v4004_v28 = vpop.f32.mrf.mxu1 }
 0xf62   :  { %v1807_v29 = vadd.f32 %v1803_v26, %v1639_v54 }
 0xf64   :  { %v1811_v30 = vsel %vm37_vm0, %v1807_v29, 0.0 }
 0xf65   :  { %1812 = vadd.xlane.f32.xlu0 %v1811_v30 }
 0xfea   :  { %v1810_v32 = vpop.xlane.xlu1 %1809 }
 0xfeb   :  { %v1814_v33 = vmul.f32 0.03125, %v1810_v32 }
 0xfed   :  { %v1816_v35 = vsub.f32 %v1806_v25, %v1814_v33 }
 0xfee   :  { %v1813_v36 = vpop.xlane.xlu0 %1812 }
 0xfef   :  { %v1815_v37 = vmul.f32 0.03125, %v1813_v36  ;;  %v1818_v38 = vmul.f32 %v1816_v35, %v1816_v35 }
 0xff1   :  { %v1817_v39 = vsub.f32 %v1807_v29, %v1815_v37  ;;  %v1820_v40 = vsel %vm37_vm0, %v1818_v38, 0.0 }
 0xff2   :  { %1821 = vadd.xlane.f32.xlu0 %v1820_v40 }
 0xff3   :  { %v1819_v43 = vmul.f32 %v1817_v39, %v1817_v39 }
 0xff5   :  { %v1823_v44 = vsel %vm37_vm0, %v1819_v43, 0.0 }
 0xff6   :  { %1824 = vadd.xlane.f32.xlu1 %v1823_v44 }
0x1007   :  { %1839 = vrot.lane.b32.xlu1 %v3721_v21, %s4289_s25 }
0x1008   :  { %1834 = vrot.lane.b32.xlu0 %v3721_v21, %s4286_s15 }
0x107b   :  { %v1822_v48 = vpop.xlane.xlu0 %1821 }
0x107c   :  { %v1826_v50 = vmul.f32 0.03125, %v1822_v48 }
0x107e   :  { %v1828_v41 = vadd.f32 1e-12, %v1826_v50 }
0x107f   :  { %v1825_v51 = vpop.xlane.xlu1 %1824  ;;  %v1835_v56 = vpop.permute.xlu0 %1834 }
0x1080   :  { %4213 = vrsqrt.f32 %v1828_v41  ;;  %v1827_v52 = vmul.f32 0.03125, %v1825_v51 }
0x1082   :  { %v1829_v53 = vadd.f32 1e-12, %v1827_v52 }
0x1083   :  { %v1840_v60 = vpop.permute.xlu1 %1839 }
0x1084   :  { %4215 = vrsqrt.f32 %v1829_v53  ;;  %v4733_v53 = vld [vmem:[%s4917_s1 + $0x1] ss:$0 sm:$0xff] }
0x108d   :  { %v4214_v54 = vpop.eup %4213 }
0x108e   :  { %v1832_v55 = vmul.f32 %v4214_v54, %v1816_v35 }
0x1090   :  { %v1837_v59 = vmul.f32 %v1835_v56, %v1832_v55 }
0x1091   :  { %v4216_v57 = vpop.eup %4215 }
0x1092   :  { %v1833_v58 = vmul.f32 %v4216_v57, %v1817_v39  ;;  %v4647_v62 = vadd.f32 %v1840_v60, %v1837_v59 }
0x1094   :  { %v1838_v61 = vmul.f32 %v1835_v56, %v1833_v58 }
0x1096   :  { %v4649_v63 = vadd.f32 %v1840_v60, %v1838_v61 }
0x1098   :  { %v1848_v0 = vpack.c.bf16 %v4649_v63, %v4647_v62 }
0x109a   :  { %4010 = vmatmul.mubr.msk.bf16.vlgmr.msra.gmra.mxu0 %vm37_vm0, %v1848_v0 }
0x109b   :  { %4015 = vmatprep.mubr.msk.f32.mxu0 %vm4288_vm1, %v4287_v16 }
0x115a   :  { %v1909_v1 = vpop.f32.mrf.mxu0 }
0x115b   :  { %v1910_v2 = vadd.f32 %v4659_v42, %v1909_v1 }
0x115c   :  { %v4011_v3 = vpop.f32.mrf.mxu0 }
0x115d   :  { %1916 = vst.msk [vmem:[#allocation2] sm:$0xff] %vm162_vm2, %v1910_v2 }
0x115e   :  { %v1912_v4 = vpop.f32.mrf.mxu0 }
0x115f   :  { %v1913_v5 = vadd.f32 %v4659_v42, %v1912_v4 }
0x1160   :  { %v4012_v6 = vpop.f32.mrf.mxu0 }
0x1161   :  { %1917 = vst.msk [vmem:[#allocation2 + $0x8] sm:$0xff] %vm162_vm2, %v1913_v5 }
0x1164   :  { %v4665_v7 = vld [vmem:[#allocation2] sm:$0xff] }
0x1165   :  { %1921 = vrot.lane.b32.xlu1 %v4665_v7, %s4286_s15 }
0x1168   :  { %v4669_v8 = vld [vmem:[#allocation2 + $0x8] sm:$0xff] }
0x1169   :  { %1998 = vrot.lane.b32.xlu1 %v4669_v8, %s4286_s15 }
0x11d7   :  { %v1922_v9 = vpop.permute.xlu1 %1921 }
0x11d8   :  { %4014 = vmatpush3.xpose.msk.msra.mxu0 %vm170_vm3, %v1922_v9 }
0x11d9   :  { %4018 = vmatprep.subr.mxu0 %v4287_v16 }
0x11db   :  { %4016 = vmatmul.mubr.msk.f32.vlgmr.msra.gmra.mxu0 %vm170_vm3, %v4665_v7  ;;  %v1999_v10 = vpop.permute.xlu1 %1998 }
0x11dc   :  { %4019 = vmatpush3.xpose.msk.msra.mxu0 %vm170_vm3, %v1999_v10  ;;  %4020 = vmatprep.mubr.msk.f32.mxu0 %vm4288_vm1, %v4287_v16 }
0x11dd   :  { %4028 = vmatprep.subr.mxu0 %v4287_v16 }
0x11df   :  { %4021 = vmatmul.mubr.msk.f32.vlgmr.msra.gmra.mxu0 %vm170_vm3, %v4669_v8 }
0x11e0   :  { %4030 = vmatprep.mubr.msk.f32.mxu0 %vm4288_vm1, %v4287_v16 }
0x129b   :  { %v1993_v11 = vpop.f32.mrf.mxu0 }
0x129c   :  { %v1994_v12 = vadd.f32 %v4423_v45, %v1993_v11 }
0x129d   :  { %v4017_v13 = vpop.f32.mrf.mxu0 }
0x129e   :  { %v2074_v14 = vsel %vm170_vm3, %v1994_v12, -inf }
0x129f   :  { %2075 = vmax.xlane.f32.xlu0 %v2074_v14  ;;  %v2070_v34 = vpop.f32.mrf.mxu0 }
0x12a0   :  { %v2071_v15 = vadd.f32 %v4429_v49, %v2070_v34 }
0x12a1   :  { %v4022_v17 = vpop.f32.mrf.mxu0 }
0x12a2   :  { %v2077_v18 = vsel %vm170_vm3, %v2071_v15, -inf }
0x12a3   :  { %2078 = vmax.xlane.f32.xlu1 %v2077_v18 }
0x12b4   :  { %2172 = vrot.lane.b32.xlu1 %v4669_v8, %s4289_s25 }
0x12b8   :  { %2255 = vrot.lane.b32.xlu1 %v4665_v7, %s4290_s26 }
0x12bc   :  { %2334 = vrot.lane.b32.xlu1 %v4669_v8, %s4290_s26 }
0x12c0   :  { %2332 = vrot.lane.b32.xlu1 %v4669_v8, %s4291_s27 }
0x1328   :  { %v2076_v45 = vpop.xlane.xlu0 %2075 }
0x1329   :  { %v2080_v19 = vsub.f32 %v1994_v12, %v2076_v45 }
0x132b   :  { %v2082_v20 = vmul.f32 1.442695, %v2080_v19 }
0x132c   :  { %v2079_v49 = vpop.xlane.xlu1 %2078 }
0x132d   :  { %4217 = vpow2.f32 %v2082_v20  ;;  %v2081_v21 = vsub.f32 %v2071_v15, %v2079_v49 }
0x132f   :  { %v2084_v22 = vmul.f32 1.442695, %v2081_v21 }
0x1330   :  { %v2173_v23 = vpop.permute.xlu1 %2172 }
0x1331   :  { %4219 = vpow2.f32 %v2084_v22  ;;  %4029 = vmatpush3.msra.mxu0 %v2173_v23 }
0x1332   :  { %4038 = vmatprep.subr.mxu0 %v4287_v16 }
0x1334   :  { %v2256_v30 = vpop.permute.xlu1 %2255 }
0x1338   :  { %v2335_v36 = vpop.permute.xlu1 %2334 }
0x133a   :  { %v4218_v24 = vpop.eup %4217 }
0x133b   :  { %v2086_v25 = vsel %vm170_vm3, %v4218_v24, 0.0 }
0x133c   :  { %2087 = vadd.xlane.f32.xlu0 %v2086_v25  ;;  %v2333_v39 = vpop.permute.xlu1 %2332 }
0x133e   :  { %v4220_v31 = vpop.eup %4219 }
0x133f   :  { %v2089_v26 = vsel %vm170_vm3, %v4220_v31, 0.0 }
0x1340   :  { %2090 = vadd.xlane.f32.xlu0 %v2089_v26 }
0x1356   :  { %2096 = vrot.lane.b32.xlu0 %v4665_v7, %s4289_s25 }
0x135a   :  { %2253 = vrot.lane.b32.xlu0 %v4665_v7, %s4291_s27 }
0x13c5   :  { %v2088_v27 = vpop.xlane.xlu0 %2087 }
0x13c6   :  { %4221 = vrcp.f32 %v2088_v27 }
0x13c9   :  { %v2091_v28 = vpop.xlane.xlu0 %2090 }
0x13ca   :  { %4223 = vrcp.f32 %v2091_v28 }
0x13cd   :  { %v2097_v29 = vpop.permute.xlu0 %2096 }
0x13ce   :  { %4024 = vmatpush3.msra.mxu1 %v2097_v29 }
0x13cf   :  { %4033 = vmatprep.subr.mxu1 %v4287_v16 }
0x13d1   :  { %v2254_v38 = vpop.permute.xlu0 %2253 }
0x13d3   :  { %v4222_v32 = vpop.eup %4221 }
0x13d4   :  { %v2094_v33 = vmul.f32 %v4222_v32, %v4218_v24 }
0x13d6   :  { %4026 = vmatmul.mubr.msk.f32.vlgmr.msra.gmra.mxu1 %vm170_vm3, %v2094_v33 }
0x13d7   :  { %v4224_v35 = vpop.eup %4223  ;;  %4034 = vmatpush3.xpose.msk.msra.mxu1 %vm170_vm3, %v2256_v30  ;;  %4035 = vmatprep.mubr.msk.f32.mxu1 %vm4288_vm1, %v4287_v16 }
0x13d8   :  { %v2095_v37 = vmul.f32 %v4224_v35, %v4220_v31  ;;  %4043 = vmatprep.subr.mxu1 %v4287_v16 }
0x13da   :  { %4031 = vmatmul.mubr.msk.f32.vlgmr.msra.gmra.mxu0 %vm170_vm3, %v2095_v37  ;;  %4036 = vmatmul.mubr.msk.f32.vlgmr.msra.gmra.mxu1 %vm170_vm3, %v2254_v38 }
0x13db   :  { %4039 = vmatpush3.xpose.msk.msra.mxu0 %vm170_vm3, %v2335_v36  ;;  %4040 = vmatprep.mubr.msk.f32.mxu0 %vm4288_vm1, %v4287_v16 }
0x13dc   :  { %4048 = vmatprep.subr.mxu0 %v4287_v16  ;;  %4045 = vmatprep.mubr.msk.f32.mxu1 %vm4288_vm1, %v4287_v16 }
0x13de   :  { %4041 = vmatmul.mubr.msk.f32.vlgmr.msra.gmra.mxu0 %vm170_vm3, %v2333_v39 }
0x13df   :  { %4050 = vmatprep.mubr.msk.f32.mxu0 %vm4288_vm1, %v4287_v16 }
0x1496   :  { %v2168_v40 = vpop.f32.mrf.mxu1 }
0x1497   :  { %2248 = vst.msk [vmem:[#allocation3] sm:$0xff] %vm170_vm3, %v2168_v40 }
0x1498   :  { %v4027_v43 = vpop.f32.mrf.mxu1 }
0x149a   :  { %v2244_v44 = vpop.f32.mrf.mxu0  ;;  %v2327_v46 = vpop.f32.mrf.mxu1 }
0x149b   :  { %2249 = vst.msk [vmem:[#allocation3 + $0x8] sm:$0xff] %vm170_vm3, %v2244_v44  ;;  %v2328_v48 = vadd.f32 %v4726_v47, %v2327_v46 }
0x149c   :  { %v4032_v50 = vpop.f32.mrf.mxu0  ;;  %v4037_v41 = vpop.f32.mrf.mxu1 }
0x149d   :  { %v2410_v51 = vsel %vm170_vm3, %v2328_v48, -inf }
0x149e   :  { %2411 = vmax.xlane.f32.xlu0 %v2410_v51  ;;  %v2406_v52 = vpop.f32.mrf.mxu0 }
0x149f   :  { %v2407_v54 = vadd.f32 %v4733_v53, %v2406_v52 }
0x14a0   :  { %v4042_v55 = vpop.f32.mrf.mxu0 }
0x14a1   :  { %v2413_v56 = vsel %vm170_vm3, %v2407_v54, -inf }
0x14a2   :  { %2414 = vmax.xlane.f32.xlu1 %v2413_v56 }
0x14b3   :  { %2508 = vrot.lane.b32.xlu1 %v4669_v8, %s4292_s28 }
0x14b7   :  { %2599 = vrot.lane.b32.xlu1 %v4665_v7, %s4293_s29 }
0x14bb   :  { %2678 = vrot.lane.b32.xlu1 %v4669_v8, %s4293_s29 }
0x14bf   :  { %2676 = vrot.lane.b32.xlu1 %v4669_v8, %s4294_s30 }
0x1527   :  { %v2412_v57 = vpop.xlane.xlu0 %2411 }
0x1528   :  { %v2416_v58 = vsub.f32 %v2328_v48, %v2412_v57 }
0x152a   :  { %v2418_v59 = vmul.f32 1.442695, %v2416_v58 }
0x152b   :  { %v2415_v60 = vpop.xlane.xlu1 %2414 }
0x152c   :  { %4225 = vpow2.f32 %v2418_v59  ;;  %v2417_v61 = vsub.f32 %v2407_v54, %v2415_v60 }
0x152e   :  { %v2420_v0 = vmul.f32 1.442695, %v2417_v61 }
0x152f   :  { %v2509_v1 = vpop.permute.xlu1 %2508 }
0x1530   :  { %4227 = vpow2.f32 %v2420_v0  ;;  %4049 = vmatpush3.msra.mxu0 %v2509_v1 }
0x1531   :  { %4058 = vmatprep.subr.mxu0 %v4287_v16 }
0x1533   :  { %v2600_v11 = vpop.permute.xlu1 %2599 }
0x1537   :  { %v2679_v34 = vpop.permute.xlu1 %2678 }
0x1539   :  { %v4226_v2 = vpop.eup %4225 }
0x153a   :  { %v2422_v3 = vsel %vm170_vm3, %v4226_v2, 0.0 }
0x153b   :  { %2423 = vadd.xlane.f32.xlu0 %v2422_v3  ;;  %v2677_v18 = vpop.permute.xlu1 %2676 }
0x153d   :  { %v4228_v4 = vpop.eup %4227 }
0x153e   :  { %v2425_v5 = vsel %vm170_vm3, %v4228_v4, 0.0 }
0x153f   :  { %2426 = vadd.xlane.f32.xlu0 %v2425_v5 }
0x1555   :  { %2432 = vrot.lane.b32.xlu0 %v4665_v7, %s4292_s28 }
0x1559   :  { %2597 = vrot.lane.b32.xlu0 %v4665_v7, %s4294_s30 }
0x15c4   :  { %v2424_v6 = vpop.xlane.xlu0 %2423 }
0x15c5   :  { %4229 = vrcp.f32 %v2424_v6 }
0x15c8   :  { %v2427_v9 = vpop.xlane.xlu0 %2426 }
0x15c9   :  { %4231 = vrcp.f32 %v2427_v9 }
0x15cc   :  { %v2433_v10 = vpop.permute.xlu0 %2432 }
0x15cd   :  { %4044 = vmatpush3.msra.mxu1 %v2433_v10 }
0x15ce   :  { %4053 = vmatprep.subr.mxu1 %v4287_v16 }
0x15d0   :  { %v2598_v17 = vpop.permute.xlu0 %2597 }
0x15d2   :  { %v4230_v12 = vpop.eup %4229 }
0x15d3   :  { %v2430_v13 = vmul.f32 %v4230_v12, %v4226_v2 }
0x15d5   :  { %4046 = vmatmul.mubr.msk.f32.vlgmr.msra.gmra.mxu1 %vm170_vm3, %v2430_v13 }
0x15d6   :  { %v4232_v14 = vpop.eup %4231  ;;  %4054 = vmatpush3.xpose.msk.msra.mxu1 %vm170_vm3, %v2600_v11  ;;  %4055 = vmatprep.mubr.msk.f32.mxu1 %vm4288_vm1, %v4287_v16 }
0x15d7   :  { %v2431_v15 = vmul.f32 %v4232_v14, %v4228_v4  ;;  %4063 = vmatprep.subr.mxu1 %v4287_v16 }
0x15d9   :  { %4051 = vmatmul.mubr.msk.f32.vlgmr.msra.gmra.mxu0 %vm170_vm3, %v2431_v15  ;;  %4056 = vmatmul.mubr.msk.f32.vlgmr.msra.gmra.mxu1 %vm170_vm3, %v2598_v17 }
0x15da   :  { %4059 = vmatpush3.xpose.msk.msra.mxu0 %vm170_vm3, %v2679_v34  ;;  %4060 = vmatprep.mubr.msk.f32.mxu0 %vm4288_vm1, %v4287_v16 }
0x15db   :  { %4068 = vmatprep.subr.mxu0 %v4287_v16  ;;  %4065 = vmatprep.mubr.msk.f32.mxu1 %vm4288_vm1, %v4287_v16 }
0x15dd   :  { %4061 = vmatmul.mubr.msk.f32.vlgmr.msra.gmra.mxu0 %vm170_vm3, %v2677_v18 }
0x15de   :  { %4070 = vmatprep.mubr.msk.f32.mxu0 %vm4288_vm1, %v4287_v16 }
0x1695   :  { %v4769_v45 = vpop.f32.mrf.mxu1 }
0x1697   :  { %v4047_v19 = vpop.f32.mrf.mxu1 }
0x1699   :  { %v4771_v20 = vpop.f32.mrf.mxu0  ;;  %v2671_v49 = vpop.f32.mrf.mxu1 }
0x169a   :  { %v2672_v21 = vadd.f32 %v4726_v47, %v2671_v49 }
0x169b   :  { %v4052_v22 = vpop.f32.mrf.mxu0  ;;  %v4057_v23 = vpop.f32.mrf.mxu1 }
0x169c   :  { %v2754_v24 = vsel %vm170_vm3, %v2672_v21, -inf }
0x169d   :  { %2755 = vmax.xlane.f32.xlu0 %v2754_v24  ;;  %v2750_v25 = vpop.f32.mrf.mxu0 }
0x169e   :  { %v2751_v31 = vadd.f32 %v4733_v53, %v2750_v25  ;;  %v4159_v25 = vld [vmem:[%s4920_s4 + $0x18] sm:$0xff]  }
0x169f   :  { %v4062_v26 = vpop.f32.mrf.mxu0 }
0x16a0   :  { %v2757_v27 = vsel %vm170_vm3, %v2751_v31, -inf }
0x16a1   :  { %2758 = vmax.xlane.f32.xlu1 %v2757_v27 }
0x16b2   :  { %2852 = vrot.lane.b32.xlu1 %v4669_v8, %s4295_s10 }
0x16b6   :  { %2943 = vrot.lane.b32.xlu1 %v4665_v7, %s4296_s11 }
0x16ba   :  { %3022 = vrot.lane.b32.xlu1 %v4669_v8, %s4296_s11 }
0x16be   :  { %3020 = vrot.lane.b32.xlu1 %v4669_v8, %s4297_s12 }
0x1726   :  { %v2756_v28 = vpop.xlane.xlu0 %2755 }
0x1727   :  { %v2760_v29 = vsub.f32 %v2672_v21, %v2756_v28 }
0x1729   :  { %v2762_v30 = vmul.f32 1.442695, %v2760_v29 }
0x172a   :  { %v2759_v32 = vpop.xlane.xlu1 %2758 }
0x172b   :  { %4233 = vpow2.f32 %v2762_v30  ;;  %v2761_v33 = vsub.f32 %v2751_v31, %v2759_v32  ;;  %v4160_v31 = vld [vmem:[%s4920_s4 + $0x10] sm:$0xff]  }
0x172d   :  { %v2764_v35 = vmul.f32 1.442695, %v2761_v33 }
0x172e   :  { %v2853_v36 = vpop.permute.xlu1 %2852 }
0x172f   :  { %4235 = vpow2.f32 %v2764_v35  ;;  %4069 = vmatpush3.msra.mxu0 %v2853_v36 }
0x1730   :  { %4078 = vmatprep.subr.mxu0 %v4287_v16 }
0x1732   :  { %v2944_v48 = vpop.permute.xlu1 %2943 }
0x1736   :  { %v3023_v52 = vpop.permute.xlu1 %3022 }
0x1738   :  { %v4234_v37 = vpop.eup %4233 }
0x1739   :  { %v2766_v38 = vsel %vm170_vm3, %v4234_v37, 0.0 }
0x173a   :  { %2767 = vadd.xlane.f32.xlu0 %v2766_v38  ;;  %v3021_v56 = vpop.permute.xlu1 %3020 }
0x173c   :  { %v4236_v39 = vpop.eup %4235 }
0x173d   :  { %v2769_v40 = vsel %vm170_vm3, %v4236_v39, 0.0 }
0x173e   :  { %2770 = vadd.xlane.f32.xlu0 %v2769_v40 }
0x1754   :  { %2776 = vrot.lane.b32.xlu0 %v4665_v7, %s4295_s10  ;;  %s4927_s10 = smov 32  }
0x1758   :  { %2941 = vrot.lane.b32.xlu0 %v4665_v7, %s4297_s12 }
0x17c3   :  { %v2768_v43 = vpop.xlane.xlu0 %2767 }
0x17c4   :  { %4237 = vrcp.f32 %v2768_v43 }
0x17c7   :  { %v2771_v44 = vpop.xlane.xlu0 %2770 }
0x17c8   :  { %4239 = vrcp.f32 %v2771_v44 }
0x17cb   :  { %v2777_v46 = vpop.permute.xlu0 %2776 }
0x17cc   :  { %4064 = vmatpush3.msra.mxu1 %v2777_v46 }
0x17cd   :  { %4073 = vmatprep.subr.mxu1 %v4287_v16 }
0x17cf   :  { %v2942_v55 = vpop.permute.xlu0 %2941 }
0x17d1   :  { %v4238_v50 = vpop.eup %4237 }
0x17d2   :  { %v2774_v41 = vmul.f32 %v4238_v50, %v4234_v37 }
0x17d4   :  { %4066 = vmatmul.mubr.msk.f32.vlgmr.msra.gmra.mxu1 %vm170_vm3, %v2774_v41 }
0x17d5   :  { %v4240_v51 = vpop.eup %4239  ;;  %4074 = vmatpush3.xpose.msk.msra.mxu1 %vm170_vm3, %v2944_v48  ;;  %4075 = vmatprep.mubr.msk.f32.mxu1 %vm4288_vm1, %v4287_v16 }
0x17d6   :  { %v2775_v54 = vmul.f32 %v4240_v51, %v4236_v39  ;;  %4083 = vmatprep.subr.mxu1 %v4287_v16  ;;  %v3769_v51 = vld [vmem:[%s4923_s7 + $0x4] ss:$0 sm:$0xff] }
0x17d8   :  { %4071 = vmatmul.mubr.msk.f32.vlgmr.msra.gmra.mxu0 %vm170_vm3, %v2775_v54  ;;  %4076 = vmatmul.mubr.msk.f32.vlgmr.msra.gmra.mxu1 %vm170_vm3, %v2942_v55 }
0x17d9   :  { %4079 = vmatpush3.xpose.msk.msra.mxu0 %vm170_vm3, %v3023_v52  ;;  %4080 = vmatprep.mubr.msk.f32.mxu0 %vm4288_vm1, %v4287_v16 }
0x17da   :  { %4088 = vmatprep.subr.mxu0 %v4287_v16  ;;  %4085 = vmatprep.mubr.msk.f32.mxu1 %vm4288_vm1, %v4287_v16 }
0x17dc   :  { %4081 = vmatmul.mubr.msk.f32.vlgmr.msra.gmra.mxu0 %vm170_vm3, %v3021_v56 }
0x17dd   :  { %4090 = vmatprep.mubr.msk.f32.mxu0 %vm4288_vm1, %v4287_v16 }
0x1894   :  { %v2848_v57 = vpop.f32.mrf.mxu1 }
0x1896   :  { %v4067_v58 = vpop.f32.mrf.mxu1 }
0x1898   :  { %v2924_v59 = vpop.f32.mrf.mxu0  ;;  %v3015_v60 = vpop.f32.mrf.mxu1 }
0x1899   :  { %v3016_v61 = vadd.f32 %v4726_v47, %v3015_v60 }
0x189a   :  { %v4072_v0 = vpop.f32.mrf.mxu0  ;;  %v4077_v1 = vpop.f32.mrf.mxu1 }
0x189b   :  { %v3098_v2 = vsel %vm170_vm3, %v3016_v61, -inf  ;;  %v4162_v0 = vld [vmem:[%s4921_s5 + $0x10] sm:$0xff]  }
0x189c   :  { %3099 = vmax.xlane.f32.xlu0 %v3098_v2  ;;  %v3094_v3 = vpop.f32.mrf.mxu0 }
0x189d   :  { %v3095_v4 = vadd.f32 %v4733_v53, %v3094_v3 }
0x189e   :  { %v4082_v5 = vpop.f32.mrf.mxu0 }
0x189f   :  { %v3101_v6 = vsel %vm170_vm3, %v3095_v4, -inf }
0x18a0   :  { %3102 = vmax.xlane.f32.xlu1 %v3101_v6 }
0x18b1   :  { %3196 = vrot.lane.b32.xlu1 %v4669_v8, %s4298_s13 }
0x18b5   :  { %2586 = vrot.lane.b32.xlu1 %v4769_v45, %s4299_s14 }
0x18b9   :  { %2588 = vrot.lane.b32.xlu1 %v4771_v20, %s4299_s14 }
0x18bd   :  { %2932 = vrot.lane.b32.xlu1 %v2924_v59, %s4300_s0 }
0x1925   :  { %v3100_v47 = vpop.xlane.xlu0 %3099 }
0x1926   :  { %v3104_v9 = vsub.f32 %v3016_v61, %v3100_v47  ;;  %v4161_v61 = vld [vmem:[%s4921_s5 + $0x18] sm:$0xff]  }
0x1928   :  { %v3106_v10 = vmul.f32 1.442695, %v3104_v9 }
0x1929   :  { %v3103_v11 = vpop.xlane.xlu1 %3102 }
0x192a   :  { %4241 = vpow2.f32 %v3106_v10  ;;  %v3105_v53 = vsub.f32 %v3095_v4, %v3103_v11 }
0x192c   :  { %v3108_v12 = vmul.f32 1.442695, %v3105_v53 }
0x192d   :  { %v3197_v13 = vpop.permute.xlu1 %3196 }
0x192e   :  { %4243 = vpow2.f32 %v3108_v12  ;;  %4089 = vmatpush3.msra.mxu0 %v3197_v13 }
0x192f   :  { %4101 = vmatprep.subr.bf16.mxu0 %v4287_v16 }
0x1931   :  { %v2587_v8 = vpop.permute.xlu1 %2586 }
0x1932   :  { %2592 = vst.msk [vmem:[#allocation3] sm:$0xff] %vm840_vm4, %v2587_v8 }
0x1935   :  { %v2589_v14 = vpop.permute.xlu1 %2588 }
0x1936   :  { %2593 = vst.msk [vmem:[#allocation3 + $0x8] sm:$0xff] %vm840_vm4, %v2589_v14 }
0x1937   :  { %v4242_v34 = vpop.eup %4241 }
0x1938   :  { %v3110_v15 = vsel %vm170_vm3, %v4242_v34, 0.0 }
0x1939   :  { %3111 = vadd.xlane.f32.xlu0 %v3110_v15  ;;  %v2933_v17 = vpop.permute.xlu1 %2932  ;;  %v4163_v15 = vld [vmem:[%s4922_s6 + $0x38] sm:$0xff]  }
0x193a   :  { %2937 = vst.msk [vmem:[#allocation3 + $0x8] sm:$0xff] %vm1185_vm5, %v2933_v17  ;;  %v4164_v17 = vld [vmem:[%s4922_s6 + $0x30] sm:$0xff]  }
0x193b   :  { %v4244_v18 = vpop.eup %4243 }
0x193c   :  { %v3113_v45 = vsel %vm170_vm3, %v4244_v18, 0.0 }
0x193d   :  { %3114 = vadd.xlane.f32.xlu0 %v3113_v45  ;;  %v4166_v45 = vld [vmem:[%s4922_s6 + $0x20] sm:$0xff]  }
0x1953   :  { %3120 = vrot.lane.b32.xlu0 %v4665_v7, %s4298_s13 }
0x1957   :  { %2930 = vrot.lane.b32.xlu0 %v2848_v57, %s4300_s0 }
0x19c2   :  { %v3112_v19 = vpop.xlane.xlu0 %3111 }
0x19c3   :  { %4245 = vrcp.f32 %v3112_v19 }
0x19c6   :  { %v3115_v20 = vpop.xlane.xlu0 %3114 }
0x19c7   :  { %4247 = vrcp.f32 %v3115_v20 }
0x19ca   :  { %v3121_v49 = vpop.permute.xlu0 %3120 }
0x19cb   :  { %4084 = vmatpush3.msra.mxu1 %v3121_v49 }
0x19cc   :  { %4093 = vmatprep.subr.bf16.mxu1 %v4287_v16 }
0x19ce   :  { %v2931_v21 = vpop.permute.xlu0 %2930 }
0x19cf   :  { %2936 = vst.msk [vmem:[#allocation3] sm:$0xff] %vm1185_vm5, %v2931_v21 }
0x19d0   :  { %v4246_v22 = vpop.eup %4245 }
0x19d1   :  { %v3118_v23 = vmul.f32 %v4246_v22, %v4242_v34 }
0x19d3   :  { %4086 = vmatmul.mubr.msk.f32.vlgmr.msra.gmra.mxu1 %vm170_vm3, %v3118_v23 }
0x19d4   :  { %v4248_v24 = vpop.eup %4247  ;;  %4097 = vmatprep.mubr.msk.bf16.mxu1 %vm4288_vm1, %v4287_v16  ;;  %4094 = vmatpush3.bf16.msra.mxu1 %v4159_v25 }
0x19d5   :  { %v3119_v7 = vmul.f32 %v4248_v24, %v4244_v18  ;;  %4095 = vmatprep.subr.bf16.mxu1 %v4287_v16  ;;  %v4165_v18 = vld [vmem:[%s4922_s6 + $0x28] sm:$0xff]  }
0x19d7   :  { %4091 = vmatmul.mubr.msk.f32.vlgmr.msra.gmra.mxu0 %vm170_vm3, %v3119_v7 }
0x19d8   :  { %4105 = vmatprep.mubr.msk.bf16.mxu0 %vm4288_vm1, %v4287_v16  ;;  %4096 = vmatpush3.bf16.msra.mxu1 %v4160_v31 }
0x19d9   :  { %4109 = vmatprep.subr.bf16.mxu1 %v4287_v16  ;;  %4102 = vmatpush3.bf16.msra.mxu0 %v4161_v61 }
0x19da   :  { %4103 = vmatprep.subr.bf16.mxu0 %v4287_v16 }
0x19dd   :  { %4104 = vmatpush3.bf16.msra.mxu0 %v4162_v0 }
0x19de   :  { %4121 = vmatprep.subr.bf16.mxu0 %v4287_v16 }
0x1a93   :  { %v3192_v26 = vpop.f32.mrf.mxu1 }
0x1a94   :  { %3274 = vrot.lane.b32.xlu0 %v3192_v26, %s4301_s20 }
0x1a95   :  { %v4087_v27 = vpop.f32.mrf.mxu1 }
0x1a97   :  { %v3268_v28 = vpop.f32.mrf.mxu0 }
0x1a98   :  { %3276 = vrot.lane.b32.xlu1 %v3268_v28, %s4301_s20  ;;  %3302 = vrot.lane.b32.xlu0 %v4659_v42, %s4927_s10 }
0x1a99   :  { %v4092_v29 = vpop.f32.mrf.mxu0 }
0x1b06   :  { %v3275_v30 = vpop.permute.xlu0 %3274 }
0x1b07   :  { %3280 = vst.msk [vmem:[#allocation3] sm:$0xff] %vm1530_vm6, %v3275_v30 }
0x1b0a   :  { %v3277_v32 = vpop.permute.xlu1 %3276  ;;  %v3303_v37 = vpop.permute.xlu0 %3302 }
0x1b0b   :  { %3281 = vst.msk [vmem:[#allocation3 + $0x8] sm:$0xff] %vm1530_vm6, %v3277_v32 }
0x1b0e   :  { %v3282_v33 = vld [vmem:[#allocation3] sm:$0xff] }
0x1b12   :  { %v3283_v35 = vld [vmem:[#allocation3 + $0x8] sm:$0xff] }
0x1b13   :  { %v3284_v36 = vpack.c.bf16 %v3283_v35, %v3282_v33 }
0x1b15   :  { %4098 = vmatmul.mubr.msk.bf16.vlgmr.msra.gmra.mxu1 %vm37_vm0, %v3284_v36 }
0x1b16   :  { %4117 = vmatprep.mubr.msk.bf16.mxu1 %vm4288_vm1, %v4287_v16  ;;  %4110 = vmatpush3.bf16.msra.mxu1 %v4163_v15 }
0x1b17   :  { %4111 = vmatprep.subr.bf16.mxu1 %v4287_v16 }
0x1b1a   :  { %4112 = vmatpush3.bf16.msra.mxu1 %v4164_v17 }
0x1b1b   :  { %4113 = vmatprep.subr.bf16.mxu1 %v4287_v16 }
0x1b1e   :  { %4114 = vmatpush3.bf16.msra.mxu1 %v4165_v18 }
0x1b1f   :  { %4115 = vmatprep.subr.bf16.mxu1 %v4287_v16 }
0x1b22   :  { %4116 = vmatpush3.bf16.msra.mxu1 %v4166_v45 }
0x1bd5   :  { %v3342_v38 = vpop.f32.mrf.mxu1 }
0x1bd6   :  { %v3343_v39 = vadd.f32 %v3342_v38, %v3303_v37 }
0x1bd7   :  { %v4099_v40 = vpop.f32.mrf.mxu1 }
0x1bd8   :  { %v3349_v42 = vadd.f32 %v3343_v39, %v4647_v62 }
0x1bd9   :  { %v3345_v43 = vpop.f32.mrf.mxu1 }
0x1bda   :  { %v3346_v44 = vadd.f32 %v3345_v43, %v3303_v37  ;;  %v3351_v46 = vsel %vm37_vm0, %v3349_v42, 0.0 }
0x1bdb   :  { %3352 = vadd.xlane.f32.xlu1 %v3351_v46  ;;  %v4100_v48 = vpop.f32.mrf.mxu1  ;;  %v3785_v46 = vld [vmem:[%s4923_s7 + $0x5] ss:$0 sm:$0xff] }
0x1bdc   :  { %v3350_v50 = vadd.f32 %v3346_v44, %v4649_v63 }
0x1bde   :  { %v3354_v41 = vsel %vm37_vm0, %v3350_v50, 0.0 }
0x1bdf   :  { %3355 = vadd.xlane.f32.xlu0 %v3354_v41 }
0x1bec   :  { %3385 = vrot.lane.b32.xlu1 %v3769_v51, %s4286_s15 }
0x1c64   :  { %v3353_v52 = vpop.xlane.xlu1 %3352 }
0x1c65   :  { %v3357_v54 = vmul.f32 0.03125, %v3353_v52 }
0x1c67   :  { %v3359_v62 = vsub.f32 %v3349_v42, %v3357_v54 }
0x1c68   :  { %v3356_v55 = vpop.xlane.xlu0 %3355  ;;  %v3386_v12 = vpop.permute.xlu1 %3385 }
0x1c69   :  { %v3358_v56 = vmul.f32 0.03125, %v3356_v55  ;;  %v3361_v57 = vmul.f32 %v3359_v62, %v3359_v62 }
0x1c6b   :  { %v3360_v58 = vsub.f32 %v3350_v50, %v3358_v56  ;;  %v3363_v59 = vsel %vm37_vm0, %v3361_v57, 0.0 }
0x1c6c   :  { %3364 = vadd.xlane.f32.xlu0 %v3363_v59 }
0x1c6d   :  { %v3362_v63 = vmul.f32 %v3360_v58, %v3360_v58 }
0x1c6f   :  { %v3366_v60 = vsel %vm37_vm0, %v3362_v63, 0.0 }
0x1c70   :  { %3367 = vadd.xlane.f32.xlu0 %v3366_v60 }
0x1c86   :  { %3408 = vrot.lane.b32.xlu0 %v3769_v51, %s4289_s25 }
0x1cf5   :  { %v3365_v1 = vpop.xlane.xlu0 %3364 }
0x1cf6   :  { %v3369_v2 = vmul.f32 0.03125, %v3365_v1 }
0x1cf8   :  { %v3371_v3 = vadd.f32 1e-12, %v3369_v2 }
0x1cf9   :  { %v3368_v4 = vpop.xlane.xlu0 %3367 }
0x1cfa   :  { %4249 = vrsqrt.f32 %v3371_v3  ;;  %v3370_v5 = vmul.f32 0.03125, %v3368_v4 }
0x1cfc   :  { %v3372_v6 = vadd.f32 1e-12, %v3370_v5  ;;  %v4263_v5 = vld [vmem:[%s4918_s2] ss:$0 sm:$0xff]  ;;  %s4303_s2 = smov [#allocation4]  }
0x1cfd   :  { %v3409_v19 = vpop.permute.xlu0 %3408 }
0x1cfe   :  { %4251 = vrsqrt.f32 %v3372_v6  ;;  %v4167_v6 = vld [vmem:[%s4924_s8 + $0x8] sm:$0xff]  }
0x1d07   :  { %v4250_v47 = vpop.eup %4249 }
0x1d08   :  { %v3375_v9 = vmul.f32 %v4250_v47, %v3359_v62  ;;  %v4168_v47 = vld [vmem:[%s4924_s8] sm:$0xff]   ;;  %s3675_s8 = sshll.u32 %s4303_s2, 4  ;;  %s3676_s8 = int_to_ptr.vmem [resolvable:$true] %s3675_s8 }
0x1d09   :  { %p4269_p1 = scmp.lt.s32.totalorder %s3676_s8, %s3676_s8 }
0x1d0a   :  { %v3383_v53 = vmul.f32 %v3769_v51, %v3375_v9 }
0x1d0b   :  { %v4252_v10 = vpop.eup %4251 }
0x1d0c   :  { %v3376_v11 = vmul.f32 %v4252_v10, %v3360_v58  ;;  %v3388_v8 = vadd.f32 %v3386_v12, %v3383_v53 }
0x1d0e   :  { %v3384_v13 = vmul.f32 %v3769_v51, %v3376_v11 }
0x1d10   :  { %v3389_v14 = vadd.f32 %v3386_v12, %v3384_v13 }
0x1d12   :  { %v3390_v34 = vpack.c.bf16 %v3389_v14, %v3388_v8 }
0x1d14   :  { %4106 = vmatmul.mubr.msk.bf16.vlgmr.msra.gmra.mxu0 %vm37_vm0, %v3390_v34 }
0x1d15   :  { %4125 = vmatprep.mubr.msk.bf16.mxu0 %vm4288_vm1, %v4287_v16  ;;  %4122 = vmatpush3.bf16.msra.mxu0 %v4167_v6 }
0x1d16   :  { %4123 = vmatprep.subr.bf16.mxu0 %v4287_v16 }
0x1d19   :  { %4124 = vmatpush3.bf16.msra.mxu0 %v4168_v47 }
0x1dd4   :  { %v3448_v20 = vpop.f32.mrf.mxu0 }
0x1dd5   :  { %v3449_v49 = vadd.f32 %v3448_v20, %v3409_v19 }
0x1dd6   :  { %v4107_v21 = vpop.f32.mrf.mxu0 }
0x1dd7   :  { %v3457_v22 = vmul.f32 0.044715, %v3449_v49  ;;  %v3455_v38 = vmul.f32 0.5, %v3449_v49 }
0x1dd8   :  { %v3451_v23 = vpop.f32.mrf.mxu0 }
0x1dd9   :  { %v3459_v24 = vmul.f32 %v3457_v22, %v3449_v49  ;;  %v3452_v7 = vadd.f32 %v3451_v23, %v3409_v19 }
0x1dda   :  { %v4108_v25 = vpop.f32.mrf.mxu0 }
0x1ddb   :  { %v3461_v31 = vmul.f32 %v3459_v24, %v3449_v49  ;;  %v3458_v26 = vmul.f32 0.044715, %v3452_v7  ;;  %v3456_v39 = vmul.f32 0.5, %v3452_v7 }
0x1ddd   :  { %v3463_v27 = vadd.f32 %v3461_v31, %v3449_v49  ;;  %v3460_v28 = vmul.f32 %v3458_v26, %v3452_v7 }
0x1ddf   :  { %v3465_v29 = vmul.f32 0.7978846, %v3463_v27  ;;  %v3462_v30 = vmul.f32 %v3460_v28, %v3452_v7 }
0x1de1   :  { %4253 = vtanh.f32 %v3465_v29  ;;  %v3464_v32 = vadd.f32 %v3462_v30, %v3452_v7 }
0x1de3   :  { %v3466_v33 = vmul.f32 0.7978846, %v3464_v32 }
0x1de5   :  { %4255 = vtanh.f32 %v3466_v33 }
0x1dee   :  { %v4254_v35 = vpop.eup %4253 }
0x1def   :  { %v3469_v36 = vadd.f32 1.0, %v4254_v35 }
0x1df1   :  { %v3471_v42 = vmul.f32 %v3469_v36, %v3455_v38 }
0x1df2   :  { %v4256_v37 = vpop.eup %4255 }
0x1df3   :  { %v3470_v40 = vadd.f32 1.0, %v4256_v37 }
0x1df5   :  { %v3472_v43 = vmul.f32 %v3470_v40, %v3456_v39 }
0x1df7   :  { %v3473_v44 = vpack.c.bf16 %v3472_v43, %v3471_v42 }
0x1df9   :  { %4118 = vmatmul.mubr.msk.bf16.vlgmr.msra.gmra.mxu1 %vm1761_vm7, %v3473_v44 }
0x1eb9   :  { %v3550_v48 = vpop.f32.mrf.mxu1 }
0x1eba   :  { %v3551_v50 = vadd.f32 %v3785_v46, %v3550_v48 }
0x1ebb   :  { %v4119_v41 = vpop.f32.mrf.mxu1 }
0x1ebc   :  { %v3557_v51 = vadd.f32 %v3551_v50, %v3388_v8 }
0x1ebd   :  { %v3553_v52 = vpop.f32.mrf.mxu1 }
0x1ebe   :  { %v3554_v54 = vadd.f32 %v3785_v46, %v3553_v52  ;;  %v3559_v62 = vsel %vm37_vm0, %v3557_v51, 0.0 }
0x1ebf   :  { %3560 = vadd.xlane.f32.xlu0 %v3559_v62  ;;  %v4120_v55 = vpop.f32.mrf.mxu1 }
0x1ec0   :  { %v3558_v56 = vadd.f32 %v3554_v54, %v3389_v14 }
0x1ec2   :  { %v3562_v57 = vsel %vm37_vm0, %v3558_v56, 0.0 }
0x1ec3   :  { %3563 = vadd.xlane.f32.xlu1 %v3562_v57 }
0x1f48   :  { %v3561_v58 = vpop.xlane.xlu0 %3560 }
0x1f49   :  { %v3565_v59 = vmul.f32 0.03125, %v3561_v58 }
0x1f4b   :  { %v3567_v63 = vsub.f32 %v3557_v51, %v3565_v59 }
0x1f4c   :  { %v3564_v60 = vpop.xlane.xlu1 %3563 }
0x1f4d   :  { %v3566_v61 = vmul.f32 0.03125, %v3564_v60  ;;  %v3569_v0 = vmul.f32 %v3567_v63, %v3567_v63 }
0x1f4f   :  { %v3568_v1 = vsub.f32 %v3558_v56, %v3566_v61  ;;  %v3571_v2 = vsel %vm37_vm0, %v3569_v0, 0.0 }
0x1f50   :  { %3572 = vadd.xlane.f32.xlu0 %v3571_v2 }
0x1f51   :  { %v3570_v3 = vmul.f32 %v3568_v1, %v3568_v1 }
0x1f53   :  { %v3574_v4 = vsel %vm37_vm0, %v3570_v3, 0.0 }
0x1f54   :  { %3575 = vadd.xlane.f32.xlu1 %v3574_v4 }
0x1f65   :  { %3585 = vrot.lane.b32.xlu1 %v3785_v46, %s4286_s15  ;;  %s4264_s15 = scalar_lea.vmem %s3676_s8, 32 }
0x1f66   :  { %3590 = vrot.lane.b32.xlu0 %v3785_v46, %s4289_s25  ;;  %p4265_p0 = scmp.ne.s32.totalorder %s3676_s8, %s4264_s15  ;;  %p4270_p2 = scmp.lt.s32.totalorder %s4264_s15, %s4264_s15 }
0x1f68   :  { %p4271_p3 = por %p4270_p2, %p4269_p1 }
0x1f69   :  { %3621 = vrot.lane.b32.xlu1 %v4263_v5, %s4289_s25 }
0x1f6a   :  { %p4272_p4 = pnand %p4271_p3, %p4265_p0 }
0x1fd9   :  { %v3573_v9 = vpop.xlane.xlu0 %3572 }
0x1fda   :  { %v3577_v10 = vmul.f32 0.03125, %v3573_v9 }
0x1fdc   :  { %v3579_v11 = vadd.f32 1e-12, %v3577_v10 }
0x1fdd   :  { %v3576_v53 = vpop.xlane.xlu1 %3575  ;;  %v3591_v18 = vpop.permute.xlu0 %3590 }
0x1fde   :  { %4257 = vrsqrt.f32 %v3579_v11  ;;  %v3578_v12 = vmul.f32 0.03125, %v3576_v53 }
0x1fe0   :  { %v3580_v13 = vadd.f32 1e-12, %v3578_v12 }
0x1fe1   :  { %v3586_v14 = vpop.permute.xlu1 %3585 }
0x1fe2   :  { %4259 = vrsqrt.f32 %v3580_v13 }
0x1fe5   :  { %v3622_v31 = vpop.permute.xlu1 %3621 }
0x1feb   :  { %v4258_v8 = vpop.eup %4257 }
0x1fec   :  { %v3583_v34 = vmul.f32 %v4258_v8, %v3567_v63 }
0x1fee   :  { %v3588_v15 = vmul.f32 %v3586_v14, %v3583_v34 }
0x1fef   :  { %v4260_v17 = vpop.eup %4259 }
0x1ff0   :  { %v3584_v16 = vmul.f32 %v4260_v17, %v3568_v1  ;;  %v3593_v19 = vadd.f32 %v3591_v18, %v3588_v15 }
0x1ff2   :  { %v3589_v45 = vmul.f32 %v3586_v14, %v3584_v16  ;;  %v3595_v49 = vpack.c.bf16 %v3593_v19, %v3593_v19 }
0x1ff4   :  { %v3594_v20 = vadd.f32 %v3591_v18, %v3589_v45  ;;  %v3603_v23 = vunpack.c.l.b16 %v3595_v49 }
0x1ff6   :  { %v3596_v21 = vpack.c.bf16 %v3594_v20, %v3594_v20 }
0x1ff8   :  { %v3604_v22 = vunpack.c.l.b16 %v3596_v21 }
0x1ffa   :  { %v3605_v24 = vrot.slane %v3604_v22, 7 }
0x1ffc   :  { %v3607_v7 = vsel %vm3606_vm8, %v3605_v24, %v3603_v23 }
0x1ffd   :  { %v3608_v25 = vpack.c.b16 %v3607_v7, %v3607_v7 }
0x1fff   :  { %4126 = vmatmul.mubr.msk.bf16.vlgmr.msra.gmra.mxu0 %vm37_vm0, %v3608_v25 }
0x20bf   :  { %v3661_v26 = vpop.f32.mrf.mxu0 }
0x20c0   :  { %v3662_v27 = vadd.f32 %v3661_v26, %v3622_v31 }
0x20c1   :  { %v4127_v28 = vpop.f32.mrf.mxu0 }
0x20c2   :  { %3668 = vst.msk [vmem:[#allocation4] sm:$0x3] %vm3667_vm9, %v3662_v27 }
0x20c3   :  { %v3664_v29 = vpop.f32.mrf.mxu0 }
0x20c4   :  { %4275 = shalt.err (!%p4272_p4)
}
0x20c5   :  { %3678 = dma.vmem_to_hbm [thread:$0]  %s3676_s8, 32, %s4925_s9, [#allocation5]   ;;  %v4128_v30 = vpop.f32.mrf.mxu0 }
0x20c6   :  { %4284 = dma.done.wait [#allocation5], 32  }
0x20c7   :  { %4285 = vsyncadd [#allocation5], 4294967264 }
0x20c8   :  { %3682 = vsyncpa [#allocation5], 1 }

</bundles_post_ra>
